<compile_context>
chip_gen: v7x
topology: tpu7x:2x2x1
jax: 0.10.0
libtpu: 0.0.40
codegen_flags: <defaults>
</compile_context>

<pallas_src>
import functools
import math

import jax
import jax.numpy as jnp
from jax.experimental import pallas as pl
from jax.experimental.pallas import tpu as pltpu


def _round_up(v, m):
    return ((v + m - 1) // m) * m


def _sigmoid(x):
    # sigmoid(x) == 0.5 * (tanh(x/2) + 1): one EUP op instead of exp + recip.
    return 0.5 * (jnp.tanh(0.5 * x) + 1.0)


def _resident_spec(shape):
    """BlockSpec for a grid-invariant operand (constant index_map).

    Single-buffers it when this JAX exposes BlockSpec.pipeline_mode, halving
    the VMEM footprint of the resident weights; otherwise falls back to the
    default (double-buffered) pipelining.
    """
    index_map = lambda i, t: (0, 0)
    try:
        return pl.BlockSpec(shape, index_map, pipeline_mode=pl.Buffered(1))
    except (AttributeError, TypeError):
        return pl.BlockSpec(shape, index_map)


def _gru_layer_kernel(
    x_ref,      # (t_chunk, row_tile, Ip)   compute dtype
    h0_ref,     # (row_tile, Hp)            compute dtype
    wx_ref,     # (Ip, 3*Hp)                compute dtype, grid-invariant
    wh_ref,     # (Hp, 3*Hp)                compute dtype, grid-invariant
    bx_ref,     # (1, 3*Hp)  f32  (x bias with r/i recurrent biases folded in)
    bhn_ref,    # (1, Hp)    f32  (n-gate recurrent bias only)
    out_ref,    # (t_chunk, row_tile, Hp)   compute dtype
    h_scratch,  # (row_tile, Hp) f32 recurrent state, resident across time
    *,
    hp,
    t_chunk,
):
    tc = pl.program_id(1)

    @pl.when(tc == 0)
    def _():
        h_scratch[...] = h0_ref[...].astype(jnp.float32)

    rows = out_ref.shape[1]
    in_dim = x_ref.shape[2]

    # Hoisted input projection: ONE (t_chunk*rows, Ip) @ (Ip, 3Hp) matmul for
    # the whole chunk.  It does not depend on the recurrence, so it is pulled
    # off the serial chain and gives the MXU a large M dimension.
    x_flat = x_ref[...].reshape(t_chunk * rows, in_dim)
    gate_x = jnp.dot(x_flat, wx_ref[...],
                     preferred_element_type=jnp.float32) + bx_ref[...]

    wh = wh_ref[...]
    bhn = bhn_ref[...]

    h = h_scratch[...]  # f32 recurrent state
    # Static unroll over the chunk: only the (rows, Hp) @ (Hp, 3Hp) recurrent
    # matmul and the VPU/EUP gate math remain on the per-step critical path.
    for t in range(t_chunk):
        gx = gate_x[t * rows:(t + 1) * rows, :]
        gate_h = jnp.dot(h.astype(wh.dtype), wh,
                         preferred_element_type=jnp.float32)
        i_r = gx[:, 0 * hp:1 * hp]
        i_i = gx[:, 1 * hp:2 * hp]
        i_n = gx[:, 2 * hp:3 * hp]
        h_r = gate_h[:, 0 * hp:1 * hp]
        h_i = gate_h[:, 1 * hp:2 * hp]
        h_n = gate_h[:, 2 * hp:3 * hp] + bhn
        resetgate = _sigmoid(i_r + h_r)
        inputgate = _sigmoid(i_i + h_i)
        newgate = jnp.tanh(i_n + resetgate * h_n)
        h = newgate + inputgate * (h - newgate)
        out_ref[t] = h.astype(out_ref.dtype)

    h_scratch[...] = h


def gru_layer_forward(x_tmi, h0, packed, *, row_tile, t_chunk):
    """One GRU layer over the full (padded) sequence.

    x_tmi: (Tp, Mp, Ip) compute dtype, h0: (Mp, Hp) compute dtype.
    Returns (Tp, Mp, Hp) compute dtype (padded hidden channels are zero).
    """
    Tp, Mp, Ip = x_tmi.shape
    Hp = packed["Hp"]
    assert Ip == packed["Ip"]
    assert Mp % row_tile == 0 and Tp % t_chunk == 0
    n_tiles = Mp // row_tile
    n_tc = Tp // t_chunk

    kernel = functools.partial(_gru_layer_kernel, hp=Hp, t_chunk=t_chunk)

    itemsize = jnp.dtype(x_tmi.dtype).itemsize
    # VMEM accounting: weights (single-buffered) + biases + double-buffered
    # h0 / x / out blocks + f32 scratch + chunk-wide gate_x and per-step
    # gate_h f32 temporaries.
    vmem_est = (
        (Ip + Hp) * 3 * Hp * itemsize
        + (3 * Hp + Hp) * 4
        + 2 * row_tile * Hp * itemsize
        + 2 * t_chunk * row_tile * (Ip + Hp) * itemsize
        + row_tile * Hp * 4
        + (t_chunk + 1) * row_tile * 3 * Hp * 4
    )
    vmem_limit = int(min(96 * 2**20, max(32 * 2**20, 2 * vmem_est)))

    cost = pl.CostEstimate(
        flops=2 * Tp * Mp * (Ip + Hp) * 3 * Hp,
        transcendentals=3 * Tp * Mp * Hp,
        bytes_accessed=(Tp * Mp * (Ip + Hp) + (Ip + Hp) * 3 * Hp + Mp * Hp)
        * itemsize,
    )

    # NOTE: the h_scratch carry pattern requires the time axis to be the
    # innermost grid dim and "arbitrary"; "parallel" may only split whole row
    # tiles (each re-inits its scratch at t_chunk index 0).  Do not reorder.
    return pl.pallas_call(
        kernel,
        out_shape=jax.ShapeDtypeStruct((Tp, Mp, Hp), x_tmi.dtype),
        grid_spec=pltpu.PrefetchScalarGridSpec(
            num_scalar_prefetch=0,
            grid=(n_tiles, n_tc),
            in_specs=[
                pl.BlockSpec((t_chunk, row_tile, Ip), lambda i, t: (t, i, 0)),
                pl.BlockSpec((row_tile, Hp), lambda i, t: (i, 0)),
                _resident_spec((Ip, 3 * Hp)),
                _resident_spec((Hp, 3 * Hp)),
                _resident_spec((1, 3 * Hp)),
                _resident_spec((1, Hp)),
            ],
            out_specs=pl.BlockSpec((t_chunk, row_tile, Hp),
                                   lambda i, t: (t, i, 0)),
            scratch_shapes=[pltpu.VMEM((row_tile, Hp), jnp.float32)],
        ),
        compiler_params=pltpu.CompilerParams(
            dimension_semantics=("parallel", "arbitrary"),
            vmem_limit_bytes=vmem_limit),
        cost_estimate=cost,
    )(x_tmi, h0, packed["wx"], packed["wh"], packed["bx"], packed["bhn"])


def pack_layer_params(raw, input_size, hidden_size, compute_dtype,
                      *, padded_input_size=None, lane_multiple=128):
    """Pre-pack PyTorch-style GRUCell params once (not per forward call).

    raw: w_x2h (3H, I), b_x2h (3H,), w_h2h (3H, H), b_h2h (3H,)  [torch Linear
    layout: y = x @ W.T + b].  Gates are packed along lane-padded columns with
    zero padding (exact results); the r/i recurrent biases are folded into bx
    so only the n-gate recurrent bias is added inside the recurrent loop.

    lane_multiple: 128 (default, always correct).  On v6e/v7x with H > 128,
    256 fills the 256x256 MXU better; keep 128 on v5e.
    """
    H = hidden_size
    Hp = _round_up(H, lane_multiple)
    Ip = (padded_input_size if padded_input_size is not None
          else _round_up(input_size, lane_multiple))
    assert Ip >= input_size
    wx = jnp.zeros((Ip, 3 * Hp), jnp.float32)
    wh = jnp.zeros((Hp, 3 * Hp), jnp.float32)
    bx = jnp.zeros((1, 3 * Hp), jnp.float32)
    bhn = jnp.zeros((1, Hp), jnp.float32)
    for g in range(3):
        wx = wx.at[:input_size, g * Hp:g * Hp + H].set(
            raw["w_x2h"][g * H:(g + 1) * H, :].T)
        wh = wh.at[:H, g * Hp:g * Hp + H].set(
            raw["w_h2h"][g * H:(g + 1) * H, :].T)
        b = raw["b_x2h"][g * H:(g + 1) * H]
        if g < 2:  # fold r/i recurrent biases into the (hoisted) x bias
            b = b + raw["b_h2h"][g * H:(g + 1) * H]
        bx = bx.at[0, g * Hp:g * Hp + H].set(b)
    bhn = bhn.at[0, :H].set(raw["b_h2h"][2 * H:3 * H])
    return {
        "wx": wx.astype(compute_dtype),
        "wh": wh.astype(compute_dtype),
        "bx": bx,
        "bhn": bhn,
        "input_size": input_size,
        "hidden_size": H,
        "Ip": Ip,
        "Hp": Hp,
    }


def rnn_forward(x, init_state, packed_layers, *, row_tile=None, t_chunk=None):
    """RNN.forward: x (B, T, N, dim_in), init_state (L, B, N, dim_out)
    -> (B, T, N, dim_out)."""
    B, T, N, dim_in = x.shape
    H = packed_layers[0]["hidden_size"]
    Hp = packed_layers[0]["Hp"]
    compute_dtype = packed_layers[0]["wx"].dtype
    M = B * N

    # Balanced row tiles (Mp stays close to M); aim for >=2 tiles when there
    # is enough work so v7x's two TensorCores both get row tiles.  Rounded to
    # 16 rows so bf16 sublane packing stays tile-aligned.
    if row_tile is None:
        n_tiles = max(pl.cdiv(M, 512), 2 if M >= 256 else 1)
        row_tile = _round_up(pl.cdiv(M, n_tiles), 16)
    else:
        row_tile = _round_up(row_tile, 16)
    Mp = _round_up(M, row_tile)

    if t_chunk is None:
        # Bound the chunk so the chunk-wide f32 gate_x temporary stays small
        # (matters on v7x's 64 MiB VMEM).
        per_step = row_tile * 3 * Hp * 4
        t_chunk = int(max(1, min(8, T, (6 * 2**20) // per_step)))
    Tp = _round_up(T, t_chunk)

    Ip0 = packed_layers[0]["Ip"]
    assert Ip0 >= dim_in
    # (B, T, N, I) -> (Tp, Mp, Ip0).  Layer-0 channels are only padded to a
    # sublane multiple (not 128) to avoid shipping 8x the necessary bytes.
    # Padded rows/timesteps carry junk that never leaks into the real outputs
    # and is sliced off below.
    x_t = jnp.transpose(x, (1, 0, 2, 3)).reshape(T, M, dim_in)
    cur = jnp.zeros((Tp, Mp, Ip0), compute_dtype).at[:T, :M, :dim_in].set(
        x_t.astype(compute_dtype))

    for layer_idx, packed in enumerate(packed_layers):
        if layer_idx > 0:
            # Layer l>0 consumes layer l-1's padded output directly.
            assert packed["Ip"] == packed_layers[layer_idx - 1]["Hp"]
        h0 = init_state[layer_idx].reshape(M, H)
        h0p = jnp.zeros((Mp, packed["Hp"]), compute_dtype).at[:M, :H].set(
            h0.astype(compute_dtype))
        cur = gru_layer_forward(cur, h0p, packed,
                                row_tile=row_tile, t_chunk=t_chunk)

    out = cur[:T, :M, :H].astype(jnp.float32)
    return jnp.transpose(out.reshape(T, B, N, H), (1, 0, 2, 3))


def init_raw_params(key, dim_in, dim_out, num_layers):
    """Matches GRUCell.reset_parameters: uniform(-1/sqrt(H), 1/sqrt(H))."""
    std = 1.0 / math.sqrt(dim_out)
    layers = []
    for layer_idx in range(num_layers):
        in_size = dim_in if layer_idx == 0 else dim_out
        key, k1, k2, k3, k4 = jax.random.split(key, 5)
        layers.append({
            "w_x2h": jax.random.uniform(k1, (3 * dim_out, in_size),
                                        jnp.float32, -std, std),
            "b_x2h": jax.random.uniform(k2, (3 * dim_out,),
                                        jnp.float32, -std, std),
            "w_h2h": jax.random.uniform(k3, (3 * dim_out, dim_out),
                                        jnp.float32, -std, std),
            "b_h2h": jax.random.uniform(k4, (3 * dim_out,),
                                        jnp.float32, -std, std),
        })
    return layers


def _gru_cell_ref(x, h, raw):
    gate_x = x @ raw["w_x2h"].T + raw["b_x2h"]
    gate_h = h @ raw["w_h2h"].T + raw["b_h2h"]
    i_r, i_i, i_n = jnp.split(gate_x, 3, axis=-1)
    h_r, h_i, h_n = jnp.split(gate_h, 3, axis=-1)
    resetgate = jax.nn.sigmoid(i_r + h_r)
    inputgate = jax.nn.sigmoid(i_i + h_i)
    newgate = jnp.tanh(i_n + resetgate * h_n)
    return newgate + inputgate * (h - newgate)


def rnn_reference(x, init_state, raw_layers):
    """Pure-JAX reference mirroring the PyTorch RNN forward."""
    B, T, N, _ = x.shape
    cur = x
    for layer_idx, raw in enumerate(raw_layers):
        state = init_state[layer_idx]
        outs = []
        for t in range(T):
            state = _gru_cell_ref(cur[:, t], state, raw)
            outs.append(state)
        cur = jnp.stack(outs, axis=1)
    return cur


if __name__ == "__main__":
    node_num = 4
    dim_in = 16
    dim_out = 32
    num_layers = 2
    batch = 2
    seq_len = 8

    key = jax.random.PRNGKey(0)
    kp, kx, kh = jax.random.split(key, 3)

    raw_layers = init_raw_params(kp, dim_in, dim_out, num_layers)
    x = jax.random.normal(kx, (batch, seq_len, node_num, dim_in), jnp.float32)
    init_state = jax.random.normal(
        kh, (num_layers, batch, node_num, dim_out), jnp.float32)

    ref = rnn_reference(x, init_state, raw_layers)

    def make_packed(compute_dtype):
        layers = []
        for layer_idx, raw in enumerate(raw_layers):
            if layer_idx == 0:
                layers.append(pack_layer_params(
                    raw, dim_in, dim_out, compute_dtype,
                    padded_input_size=_round_up(dim_in, 8)))
            else:
                layers.append(pack_layer_params(
                    raw, dim_out, dim_out, compute_dtype,
                    padded_input_size=layers[-1]["Hp"]))
        return layers

    # f32 path: tight numerical check of the kernel semantics.
    packed_f32 = make_packed(jnp.float32)
    out_f32 = jax.block_until_ready(rnn_forward(x, init_state, packed_f32))
    assert out_f32.shape == (batch, seq_len, node_num, dim_out)
    assert jnp.allclose(out_f32, ref, atol=1e-3, rtol=1e-3)

    # bf16 path (default, bandwidth-optimized): loose check.
    packed_bf16 = make_packed(jnp.bfloat16)
    out_bf16 = jax.block_until_ready(rnn_forward(x, init_state, packed_bf16))
    assert out_bf16.shape == (batch, seq_len, node_num, dim_out)
    assert jnp.allclose(out_bf16, ref, atol=1e-1, rtol=1e-1)

    print("KERNEL_OK")
</pallas_src>

<mosaic_0001>
module attributes {stable_mosaic.version = 11 : i64} {
  func.func @_gru_layer_kernel(%arg0: i32, %arg1: i32, %arg2: memref<8x16x16xf32, #tpu.memory_space<vmem>>, %arg3: memref<16x128xf32, #tpu.memory_space<vmem>>, %arg4: memref<16x384xf32, #tpu.memory_space<vmem>>, %arg5: memref<128x384xf32, #tpu.memory_space<vmem>>, %arg6: memref<1x384xf32, #tpu.memory_space<vmem>>, %arg7: memref<1x128xf32, #tpu.memory_space<vmem>>, %arg8: memref<8x16x128xf32, #tpu.memory_space<vmem>>, %arg9: memref<16x128xf32, #tpu.memory_space<vmem>>) attributes {dimension_semantics = [#tpu.dimension_semantics<parallel>, #tpu.dimension_semantics<arbitrary>], iteration_bounds = array<i64: 1, 1>, scalar_prefetch = 0 : i64, scratch_operands = 1 : i64, tpu.core_type = #tpu.core_type<tc>, window_params = [{transform_indices = @transform_0, window_bounds = array<i64: 8, 16, 16>}, {transform_indices = @transform_1, window_bounds = array<i64: 16, 128>}, {pipeline_mode = #tpu.pipeline_mode<synchronous>, transform_indices = @transform_2, window_bounds = array<i64: 16, 384>}, {pipeline_mode = #tpu.pipeline_mode<synchronous>, transform_indices = @transform_3, window_bounds = array<i64: 128, 384>}, {pipeline_mode = #tpu.pipeline_mode<synchronous>, transform_indices = @transform_4, window_bounds = array<i64: 1, 384>}, {pipeline_mode = #tpu.pipeline_mode<synchronous>, transform_indices = @transform_5, window_bounds = array<i64: 1, 128>}, {transform_indices = @transform_6, window_bounds = array<i64: 8, 16, 128>}]} {
    %c0_i32 = arith.constant 0 : i32
    %0 = arith.cmpi eq, %arg1, %c0_i32 : i32
    %1 = arith.extui %0 : i1 to i32
    %c0_i32_0 = arith.constant 0 : i32
    %2 = arith.cmpi ne, %1, %c0_i32_0 : i32
    scf.if %2 {
      %c0_88 = arith.constant 0 : index
      %c0_89 = arith.constant 0 : index
      %294 = vector.load %arg3[%c0_88, %c0_89] : memref<16x128xf32, #tpu.memory_space<vmem>>, vector<16x128xf32>
      %c0_90 = arith.constant 0 : index
      %c0_91 = arith.constant 0 : index
      %295 = vector.load %arg9[%c0_90, %c0_91] : memref<16x128xf32, #tpu.memory_space<vmem>>, vector<16x128xf32>
      tpu.vector_store %arg9[%c0_90, %c0_91], %294 {strides = array<i32>} : memref<16x128xf32, #tpu.memory_space<vmem>>, vector<16x128xf32>,
    } else {
    }
    %c0 = arith.constant 0 : index
    %c0_1 = arith.constant 0 : index
    %c0_2 = arith.constant 0 : index
    %3 = vector.load %arg2[%c0, %c0_1, %c0_2] : memref<8x16x16xf32, #tpu.memory_space<vmem>>, vector<8x16x16xf32>
    %4 = vector.shape_cast %3 : vector<8x16x16xf32> to vector<128x16xf32>
    %c0_3 = arith.constant 0 : index
    %c0_4 = arith.constant 0 : index
    %5 = vector.load %arg4[%c0_3, %c0_4] : memref<16x384xf32, #tpu.memory_space<vmem>>, vector<16x384xf32>
    %cst = arith.constant dense<0.000000e+00> : vector<128x384xf32>
    %6 = tpu.matmul %4, %5, %cst {dimension_numbers = #tpu.dot_dimension_numbers<[1], [0], [0], [1], [0, 0, 1, 1], [], []>} : vector<128x16xf32>, vector<16x384xf32>, vector<128x384xf32> -> vector<128x384xf32>
    %c0_5 = arith.constant 0 : index
    %c0_6 = arith.constant 0 : index
    %7 = vector.load %arg6[%c0_5, %c0_6] : memref<1x384xf32, #tpu.memory_space<vmem>>, vector<1x384xf32>
    %8 = vector.broadcast %7 : vector<1x384xf32> to vector<128x384xf32>
    %9 = arith.addf %6, %8 : vector<128x384xf32>
    %c0_7 = arith.constant 0 : index
    %c0_8 = arith.constant 0 : index
    %10 = vector.load %arg5[%c0_7, %c0_8] : memref<128x384xf32, #tpu.memory_space<vmem>>, vector<128x384xf32>
    %c0_9 = arith.constant 0 : index
    %c0_10 = arith.constant 0 : index
    %11 = vector.load %arg7[%c0_9, %c0_10] : memref<1x128xf32, #tpu.memory_space<vmem>>, vector<1x128xf32>
    %c0_11 = arith.constant 0 : index
    %c0_12 = arith.constant 0 : index
    %12 = vector.load %arg9[%c0_11, %c0_12] : memref<16x128xf32, #tpu.memory_space<vmem>>, vector<16x128xf32>
    %13 = vector.extract_strided_slice %9 {offsets = [0, 0], sizes = [16, 384], strides = [1, 1]} : vector<128x384xf32> to vector<16x384xf32>
    %cst_13 = arith.constant dense<0.000000e+00> : vector<16x384xf32>
    %14 = tpu.matmul %12, %10, %cst_13 {dimension_numbers = #tpu.dot_dimension_numbers<[1], [0], [0], [1], [0, 0, 1, 1], [], []>} : vector<16x128xf32>, vector<128x384xf32>, vector<16x384xf32> -> vector<16x384xf32>
    %15 = vector.extract_strided_slice %13 {offsets = [0, 0], sizes = [16, 128], strides = [1, 1]} : vector<16x384xf32> to vector<16x128xf32>
    %16 = vector.extract_strided_slice %13 {offsets = [0, 128], sizes = [16, 128], strides = [1, 1]} : vector<16x384xf32> to vector<16x128xf32>
    %17 = vector.extract_strided_slice %13 {offsets = [0, 256], sizes = [16, 128], strides = [1, 1]} : vector<16x384xf32> to vector<16x128xf32>
    %18 = vector.extract_strided_slice %14 {offsets = [0, 0], sizes = [16, 128], strides = [1, 1]} : vector<16x384xf32> to vector<16x128xf32>
    %19 = vector.extract_strided_slice %14 {offsets = [0, 128], sizes = [16, 128], strides = [1, 1]} : vector<16x384xf32> to vector<16x128xf32>
    %20 = vector.extract_strided_slice %14 {offsets = [0, 256], sizes = [16, 128], strides = [1, 1]} : vector<16x384xf32> to vector<16x128xf32>
    %21 = vector.broadcast %11 : vector<1x128xf32> to vector<16x128xf32>
    %22 = arith.addf %20, %21 : vector<16x128xf32>
    %23 = arith.addf %15, %18 : vector<16x128xf32>
    %cst_14 = arith.constant 5.000000e-01 : f32
    %24 = vector.broadcast %cst_14 : f32 to vector<16x128xf32>
    %25 = arith.mulf %24, %23 : vector<16x128xf32>
    %26 = math.tanh %25 : vector<16x128xf32>
    %cst_15 = arith.constant 1.000000e+00 : f32
    %27 = vector.broadcast %cst_15 : f32 to vector<16x128xf32>
    %28 = arith.addf %26, %27 : vector<16x128xf32>
    %cst_16 = arith.constant 5.000000e-01 : f32
    %29 = vector.broadcast %cst_16 : f32 to vector<16x128xf32>
    %30 = arith.mulf %29, %28 : vector<16x128xf32>
    %31 = arith.addf %16, %19 : vector<16x128xf32>
    %cst_17 = arith.constant 5.000000e-01 : f32
    %32 = vector.broadcast %cst_17 : f32 to vector<16x128xf32>
    %33 = arith.mulf %32, %31 : vector<16x128xf32>
    %34 = math.tanh %33 : vector<16x128xf32>
    %cst_18 = arith.constant 1.000000e+00 : f32
    %35 = vector.broadcast %cst_18 : f32 to vector<16x128xf32>
    %36 = arith.addf %34, %35 : vector<16x128xf32>
    %cst_19 = arith.constant 5.000000e-01 : f32
    %37 = vector.broadcast %cst_19 : f32 to vector<16x128xf32>
    %38 = arith.mulf %37, %36 : vector<16x128xf32>
    %39 = arith.mulf %30, %22 : vector<16x128xf32>
    %40 = arith.addf %17, %39 : vector<16x128xf32>
    %41 = math.tanh %40 : vector<16x128xf32>
    %42 = arith.subf %12, %41 : vector<16x128xf32>
    %43 = arith.mulf %38, %42 : vector<16x128xf32>
    %44 = arith.addf %41, %43 : vector<16x128xf32>
    %c0_20 = arith.constant 0 : index
    %c0_21 = arith.constant 0 : index
    %c0_22 = arith.constant 0 : index
    %45 = vector.load %arg8[%c0_20, %c0_21, %c0_22] : memref<8x16x128xf32, #tpu.memory_space<vmem>>, vector<1x16x128xf32>
    %46 = vector.shape_cast %45 : vector<1x16x128xf32> to vector<16x128xf32>
    %47 = vector.shape_cast %44 : vector<16x128xf32> to vector<1x16x128xf32>
    tpu.vector_store %arg8[%c0_20, %c0_21, %c0_22], %47 {strides = array<i32>} : memref<8x16x128xf32, #tpu.memory_space<vmem>>, vector<1x16x128xf32>,
    %48 = vector.extract_strided_slice %9 {offsets = [16, 0], sizes = [16, 384], strides = [1, 1]} : vector<128x384xf32> to vector<16x384xf32>
    %cst_23 = arith.constant dense<0.000000e+00> : vector<16x384xf32>
    %49 = tpu.matmul %44, %10, %cst_23 {dimension_numbers = #tpu.dot_dimension_numbers<[1], [0], [0], [1], [0, 0, 1, 1], [], []>} : vector<16x128xf32>, vector<128x384xf32>, vector<16x384xf32> -> vector<16x384xf32>
    %50 = vector.extract_strided_slice %48 {offsets = [0, 0], sizes = [16, 128], strides = [1, 1]} : vector<16x384xf32> to vector<16x128xf32>
    %51 = vector.extract_strided_slice %48 {offsets = [0, 128], sizes = [16, 128], strides = [1, 1]} : vector<16x384xf32> to vector<16x128xf32>
    %52 = vector.extract_strided_slice %48 {offsets = [0, 256], sizes = [16, 128], strides = [1, 1]} : vector<16x384xf32> to vector<16x128xf32>
    %53 = vector.extract_strided_slice %49 {offsets = [0, 0], sizes = [16, 128], strides = [1, 1]} : vector<16x384xf32> to vector<16x128xf32>
    %54 = vector.extract_strided_slice %49 {offsets = [0, 128], sizes = [16, 128], strides = [1, 1]} : vector<16x384xf32> to vector<16x128xf32>
    %55 = vector.extract_strided_slice %49 {offsets = [0, 256], sizes = [16, 128], strides = [1, 1]} : vector<16x384xf32> to vector<16x128xf32>
    %56 = vector.broadcast %11 : vector<1x128xf32> to vector<16x128xf32>
    %57 = arith.addf %55, %56 : vector<16x128xf32>
    %58 = arith.addf %50, %53 : vector<16x128xf32>
    %cst_24 = arith.constant 5.000000e-01 : f32
    %59 = vector.broadcast %cst_24 : f32 to vector<16x128xf32>
    %60 = arith.mulf %59, %58 : vector<16x128xf32>
    %61 = math.tanh %60 : vector<16x128xf32>
    %cst_25 = arith.constant 1.000000e+00 : f32
    %62 = vector.broadcast %cst_25 : f32 to vector<16x128xf32>
    %63 = arith.addf %61, %62 : vector<16x128xf32>
    %cst_26 = arith.constant 5.000000e-01 : f32
    %64 = vector.broadcast %cst_26 : f32 to vector<16x128xf32>
    %65 = arith.mulf %64, %63 : vector<16x128xf32>
    %66 = arith.addf %51, %54 : vector<16x128xf32>
    %cst_27 = arith.constant 5.000000e-01 : f32
    %67 = vector.broadcast %cst_27 : f32 to vector<16x128xf32>
    %68 = arith.mulf %67, %66 : vector<16x128xf32>
    %69 = math.tanh %68 : vector<16x128xf32>
    %cst_28 = arith.constant 1.000000e+00 : f32
    %70 = vector.broadcast %cst_28 : f32 to vector<16x128xf32>
    %71 = arith.addf %69, %70 : vector<16x128xf32>
    %cst_29 = arith.constant 5.000000e-01 : f32
    %72 = vector.broadcast %cst_29 : f32 to vector<16x128xf32>
    %73 = arith.mulf %72, %71 : vector<16x128xf32>
    %74 = arith.mulf %65, %57 : vector<16x128xf32>
    %75 = arith.addf %52, %74 : vector<16x128xf32>
    %76 = math.tanh %75 : vector<16x128xf32>
    %77 = arith.subf %44, %76 : vector<16x128xf32>
    %78 = arith.mulf %73, %77 : vector<16x128xf32>
    %79 = arith.addf %76, %78 : vector<16x128xf32>
    %c1 = arith.constant 1 : index
    %c0_30 = arith.constant 0 : index
    %c0_31 = arith.constant 0 : index
    %80 = vector.load %arg8[%c1, %c0_30, %c0_31] : memref<8x16x128xf32, #tpu.memory_space<vmem>>, vector<1x16x128xf32>
    %81 = vector.shape_cast %80 : vector<1x16x128xf32> to vector<16x128xf32>
    %82 = vector.shape_cast %79 : vector<16x128xf32> to vector<1x16x128xf32>
    tpu.vector_store %arg8[%c1, %c0_30, %c0_31], %82 {strides = array<i32>} : memref<8x16x128xf32, #tpu.memory_space<vmem>>, vector<1x16x128xf32>,
    %83 = vector.extract_strided_slice %9 {offsets = [32, 0], sizes = [16, 384], strides = [1, 1]} : vector<128x384xf32> to vector<16x384xf32>
    %cst_32 = arith.constant dense<0.000000e+00> : vector<16x384xf32>
    %84 = tpu.matmul %79, %10, %cst_32 {dimension_numbers = #tpu.dot_dimension_numbers<[1], [0], [0], [1], [0, 0, 1, 1], [], []>} : vector<16x128xf32>, vector<128x384xf32>, vector<16x384xf32> -> vector<16x384xf32>
    %85 = vector.extract_strided_slice %83 {offsets = [0, 0], sizes = [16, 128], strides = [1, 1]} : vector<16x384xf32> to vector<16x128xf32>
    %86 = vector.extract_strided_slice %83 {offsets = [0, 128], sizes = [16, 128], strides = [1, 1]} : vector<16x384xf32> to vector<16x128xf32>
    %87 = vector.extract_strided_slice %83 {offsets = [0, 256], sizes = [16, 128], strides = [1, 1]} : vector<16x384xf32> to vector<16x128xf32>
    %88 = vector.extract_strided_slice %84 {offsets = [0, 0], sizes = [16, 128], strides = [1, 1]} : vector<16x384xf32> to vector<16x128xf32>
    %89 = vector.extract_strided_slice %84 {offsets = [0, 128], sizes = [16, 128], strides = [1, 1]} : vector<16x384xf32> to vector<16x128xf32>
    %90 = vector.extract_strided_slice %84 {offsets = [0, 256], sizes = [16, 128], strides = [1, 1]} : vector<16x384xf32> to vector<16x128xf32>
    %91 = vector.broadcast %11 : vector<1x128xf32> to vector<16x128xf32>
    %92 = arith.addf %90, %91 : vector<16x128xf32>
    %93 = arith.addf %85, %88 : vector<16x128xf32>
    %cst_33 = arith.constant 5.000000e-01 : f32
    %94 = vector.broadcast %cst_33 : f32 to vector<16x128xf32>
    %95 = arith.mulf %94, %93 : vector<16x128xf32>
    %96 = math.tanh %95 : vector<16x128xf32>
    %cst_34 = arith.constant 1.000000e+00 : f32
    %97 = vector.broadcast %cst_34 : f32 to vector<16x128xf32>
    %98 = arith.addf %96, %97 : vector<16x128xf32>
    %cst_35 = arith.constant 5.000000e-01 : f32
    %99 = vector.broadcast %cst_35 : f32 to vector<16x128xf32>
    %100 = arith.mulf %99, %98 : vector<16x128xf32>
    %101 = arith.addf %86, %89 : vector<16x128xf32>
    %cst_36 = arith.constant 5.000000e-01 : f32
    %102 = vector.broadcast %cst_36 : f32 to vector<16x128xf32>
    %103 = arith.mulf %102, %101 : vector<16x128xf32>
    %104 = math.tanh %103 : vector<16x128xf32>
    %cst_37 = arith.constant 1.000000e+00 : f32
    %105 = vector.broadcast %cst_37 : f32 to vector<16x128xf32>
    %106 = arith.addf %104, %105 : vector<16x128xf32>
    %cst_38 = arith.constant 5.000000e-01 : f32
    %107 = vector.broadcast %cst_38 : f32 to vector<16x128xf32>
    %108 = arith.mulf %107, %106 : vector<16x128xf32>
    %109 = arith.mulf %100, %92 : vector<16x128xf32>
    %110 = arith.addf %87, %109 : vector<16x128xf32>
    %111 = math.tanh %110 : vector<16x128xf32>
    %112 = arith.subf %79, %111 : vector<16x128xf32>
    %113 = arith.mulf %108, %112 : vector<16x128xf32>
    %114 = arith.addf %111, %113 : vector<16x128xf32>
    %c2 = arith.constant 2 : index
    %c0_39 = arith.constant 0 : index
    %c0_40 = arith.constant 0 : index
    %115 = vector.load %arg8[%c2, %c0_39, %c0_40] : memref<8x16x128xf32, #tpu.memory_space<vmem>>, vector<1x16x128xf32>
    %116 = vector.shape_cast %115 : vector<1x16x128xf32> to vector<16x128xf32>
    %117 = vector.shape_cast %114 : vector<16x128xf32> to vector<1x16x128xf32>
    tpu.vector_store %arg8[%c2, %c0_39, %c0_40], %117 {strides = array<i32>} : memref<8x16x128xf32, #tpu.memory_space<vmem>>, vector<1x16x128xf32>,
    %118 = vector.extract_strided_slice %9 {offsets = [48, 0], sizes = [16, 384], strides = [1, 1]} : vector<128x384xf32> to vector<16x384xf32>
    %cst_41 = arith.constant dense<0.000000e+00> : vector<16x384xf32>
    %119 = tpu.matmul %114, %10, %cst_41 {dimension_numbers = #tpu.dot_dimension_numbers<[1], [0], [0], [1], [0, 0, 1, 1], [], []>} : vector<16x128xf32>, vector<128x384xf32>, vector<16x384xf32> -> vector<16x384xf32>
    %120 = vector.extract_strided_slice %118 {offsets = [0, 0], sizes = [16, 128], strides = [1, 1]} : vector<16x384xf32> to vector<16x128xf32>
    %121 = vector.extract_strided_slice %118 {offsets = [0, 128], sizes = [16, 128], strides = [1, 1]} : vector<16x384xf32> to vector<16x128xf32>
    %122 = vector.extract_strided_slice %118 {offsets = [0, 256], sizes = [16, 128], strides = [1, 1]} : vector<16x384xf32> to vector<16x128xf32>
    %123 = vector.extract_strided_slice %119 {offsets = [0, 0], sizes = [16, 128], strides = [1, 1]} : vector<16x384xf32> to vector<16x128xf32>
    %124 = vector.extract_strided_slice %119 {offsets = [0, 128], sizes = [16, 128], strides = [1, 1]} : vector<16x384xf32> to vector<16x128xf32>
    %125 = vector.extract_strided_slice %119 {offsets = [0, 256], sizes = [16, 128], strides = [1, 1]} : vector<16x384xf32> to vector<16x128xf32>
    %126 = vector.broadcast %11 : vector<1x128xf32> to vector<16x128xf32>
    %127 = arith.addf %125, %126 : vector<16x128xf32>
    %128 = arith.addf %120, %123 : vector<16x128xf32>
    %cst_42 = arith.constant 5.000000e-01 : f32
    %129 = vector.broadcast %cst_42 : f32 to vector<16x128xf32>
    %130 = arith.mulf %129, %128 : vector<16x128xf32>
    %131 = math.tanh %130 : vector<16x128xf32>
    %cst_43 = arith.constant 1.000000e+00 : f32
    %132 = vector.broadcast %cst_43 : f32 to vector<16x128xf32>
    %133 = arith.addf %131, %132 : vector<16x128xf32>
    %cst_44 = arith.constant 5.000000e-01 : f32
    %134 = vector.broadcast %cst_44 : f32 to vector<16x128xf32>
    %135 = arith.mulf %134, %133 : vector<16x128xf32>
    %136 = arith.addf %121, %124 : vector<16x128xf32>
    %cst_45 = arith.constant 5.000000e-01 : f32
    %137 = vector.broadcast %cst_45 : f32 to vector<16x128xf32>
    %138 = arith.mulf %137, %136 : vector<16x128xf32>
    %139 = math.tanh %138 : vector<16x128xf32>
    %cst_46 = arith.constant 1.000000e+00 : f32
    %140 = vector.broadcast %cst_46 : f32 to vector<16x128xf32>
    %141 = arith.addf %139, %140 : vector<16x128xf32>
    %cst_47 = arith.constant 5.000000e-01 : f32
    %142 = vector.broadcast %cst_47 : f32 to vector<16x128xf32>
    %143 = arith.mulf %142, %141 : vector<16x128xf32>
    %144 = arith.mulf %135, %127 : vector<16x128xf32>
    %145 = arith.addf %122, %144 : vector<16x128xf32>
    %146 = math.tanh %145 : vector<16x128xf32>
    %147 = arith.subf %114, %146 : vector<16x128xf32>
    %148 = arith.mulf %143, %147 : vector<16x128xf32>
    %149 = arith.addf %146, %148 : vector<16x128xf32>
    %c3 = arith.constant 3 : index
    %c0_48 = arith.constant 0 : index
    %c0_49 = arith.constant 0 : index
    %150 = vector.load %arg8[%c3, %c0_48, %c0_49] : memref<8x16x128xf32, #tpu.memory_space<vmem>>, vector<1x16x128xf32>
    %151 = vector.shape_cast %150 : vector<1x16x128xf32> to vector<16x128xf32>
    %152 = vector.shape_cast %149 : vector<16x128xf32> to vector<1x16x128xf32>
    tpu.vector_store %arg8[%c3, %c0_48, %c0_49], %152 {strides = array<i32>} : memref<8x16x128xf32, #tpu.memory_space<vmem>>, vector<1x16x128xf32>,
    %153 = vector.extract_strided_slice %9 {offsets = [64, 0], sizes = [16, 384], strides = [1, 1]} : vector<128x384xf32> to vector<16x384xf32>
    %cst_50 = arith.constant dense<0.000000e+00> : vector<16x384xf32>
    %154 = tpu.matmul %149, %10, %cst_50 {dimension_numbers = #tpu.dot_dimension_numbers<[1], [0], [0], [1], [0, 0, 1, 1], [], []>} : vector<16x128xf32>, vector<128x384xf32>, vector<16x384xf32> -> vector<16x384xf32>
    %155 = vector.extract_strided_slice %153 {offsets = [0, 0], sizes = [16, 128], strides = [1, 1]} : vector<16x384xf32> to vector<16x128xf32>
    %156 = vector.extract_strided_slice %153 {offsets = [0, 128], sizes = [16, 128], strides = [1, 1]} : vector<16x384xf32> to vector<16x128xf32>
    %157 = vector.extract_strided_slice %153 {offsets = [0, 256], sizes = [16, 128], strides = [1, 1]} : vector<16x384xf32> to vector<16x128xf32>
    %158 = vector.extract_strided_slice %154 {offsets = [0, 0], sizes = [16, 128], strides = [1, 1]} : vector<16x384xf32> to vector<16x128xf32>
    %159 = vector.extract_strided_slice %154 {offsets = [0, 128], sizes = [16, 128], strides = [1, 1]} : vector<16x384xf32> to vector<16x128xf32>
    %160 = vector.extract_strided_slice %154 {offsets = [0, 256], sizes = [16, 128], strides = [1, 1]} : vector<16x384xf32> to vector<16x128xf32>
    %161 = vector.broadcast %11 : vector<1x128xf32> to vector<16x128xf32>
    %162 = arith.addf %160, %161 : vector<16x128xf32>
    %163 = arith.addf %155, %158 : vector<16x128xf32>
    %cst_51 = arith.constant 5.000000e-01 : f32
    %164 = vector.broadcast %cst_51 : f32 to vector<16x128xf32>
    %165 = arith.mulf %164, %163 : vector<16x128xf32>
    %166 = math.tanh %165 : vector<16x128xf32>
    %cst_52 = arith.constant 1.000000e+00 : f32
    %167 = vector.broadcast %cst_52 : f32 to vector<16x128xf32>
    %168 = arith.addf %166, %167 : vector<16x128xf32>
    %cst_53 = arith.constant 5.000000e-01 : f32
    %169 = vector.broadcast %cst_53 : f32 to vector<16x128xf32>
    %170 = arith.mulf %169, %168 : vector<16x128xf32>
    %171 = arith.addf %156, %159 : vector<16x128xf32>
    %cst_54 = arith.constant 5.000000e-01 : f32
    %172 = vector.broadcast %cst_54 : f32 to vector<16x128xf32>
    %173 = arith.mulf %172, %171 : vector<16x128xf32>
    %174 = math.tanh %173 : vector<16x128xf32>
    %cst_55 = arith.constant 1.000000e+00 : f32
    %175 = vector.broadcast %cst_55 : f32 to vector<16x128xf32>
    %176 = arith.addf %174, %175 : vector<16x128xf32>
    %cst_56 = arith.constant 5.000000e-01 : f32
    %177 = vector.broadcast %cst_56 : f32 to vector<16x128xf32>
    %178 = arith.mulf %177, %176 : vector<16x128xf32>
    %179 = arith.mulf %170, %162 : vector<16x128xf32>
    %180 = arith.addf %157, %179 : vector<16x128xf32>
    %181 = math.tanh %180 : vector<16x128xf32>
    %182 = arith.subf %149, %181 : vector<16x128xf32>
    %183 = arith.mulf %178, %182 : vector<16x128xf32>
    %184 = arith.addf %181, %183 : vector<16x128xf32>
    %c4 = arith.constant 4 : index
    %c0_57 = arith.constant 0 : index
    %c0_58 = arith.constant 0 : index
    %185 = vector.load %arg8[%c4, %c0_57, %c0_58] : memref<8x16x128xf32, #tpu.memory_space<vmem>>, vector<1x16x128xf32>
    %186 = vector.shape_cast %185 : vector<1x16x128xf32> to vector<16x128xf32>
    %187 = vector.shape_cast %184 : vector<16x128xf32> to vector<1x16x128xf32>
    tpu.vector_store %arg8[%c4, %c0_57, %c0_58], %187 {strides = array<i32>} : memref<8x16x128xf32, #tpu.memory_space<vmem>>, vector<1x16x128xf32>,
    %188 = vector.extract_strided_slice %9 {offsets = [80, 0], sizes = [16, 384], strides = [1, 1]} : vector<128x384xf32> to vector<16x384xf32>
    %cst_59 = arith.constant dense<0.000000e+00> : vector<16x384xf32>
    %189 = tpu.matmul %184, %10, %cst_59 {dimension_numbers = #tpu.dot_dimension_numbers<[1], [0], [0], [1], [0, 0, 1, 1], [], []>} : vector<16x128xf32>, vector<128x384xf32>, vector<16x384xf32> -> vector<16x384xf32>
    %190 = vector.extract_strided_slice %188 {offsets = [0, 0], sizes = [16, 128], strides = [1, 1]} : vector<16x384xf32> to vector<16x128xf32>
    %191 = vector.extract_strided_slice %188 {offsets = [0, 128], sizes = [16, 128], strides = [1, 1]} : vector<16x384xf32> to vector<16x128xf32>
    %192 = vector.extract_strided_slice %188 {offsets = [0, 256], sizes = [16, 128], strides = [1, 1]} : vector<16x384xf32> to vector<16x128xf32>
    %193 = vector.extract_strided_slice %189 {offsets = [0, 0], sizes = [16, 128], strides = [1, 1]} : vector<16x384xf32> to vector<16x128xf32>
    %194 = vector.extract_strided_slice %189 {offsets = [0, 128], sizes = [16, 128], strides = [1, 1]} : vector<16x384xf32> to vector<16x128xf32>
    %195 = vector.extract_strided_slice %189 {offsets = [0, 256], sizes = [16, 128], strides = [1, 1]} : vector<16x384xf32> to vector<16x128xf32>
    %196 = vector.broadcast %11 : vector<1x128xf32> to vector<16x128xf32>
    %197 = arith.addf %195, %196 : vector<16x128xf32>
    %198 = arith.addf %190, %193 : vector<16x128xf32>
    %cst_60 = arith.constant 5.000000e-01 : f32
    %199 = vector.broadcast %cst_60 : f32 to vector<16x128xf32>
    %200 = arith.mulf %199, %198 : vector<16x128xf32>
    %201 = math.tanh %200 : vector<16x128xf32>
    %cst_61 = arith.constant 1.000000e+00 : f32
    %202 = vector.broadcast %cst_61 : f32 to vector<16x128xf32>
    %203 = arith.addf %201, %202 : vector<16x128xf32>
    %cst_62 = arith.constant 5.000000e-01 : f32
    %204 = vector.broadcast %cst_62 : f32 to vector<16x128xf32>
    %205 = arith.mulf %204, %203 : vector<16x128xf32>
    %206 = arith.addf %191, %194 : vector<16x128xf32>
    %cst_63 = arith.constant 5.000000e-01 : f32
    %207 = vector.broadcast %cst_63 : f32 to vector<16x128xf32>
    %208 = arith.mulf %207, %206 : vector<16x128xf32>
    %209 = math.tanh %208 : vector<16x128xf32>
    %cst_64 = arith.constant 1.000000e+00 : f32
    %210 = vector.broadcast %cst_64 : f32 to vector<16x128xf32>
    %211 = arith.addf %209, %210 : vector<16x128xf32>
    %cst_65 = arith.constant 5.000000e-01 : f32
    %212 = vector.broadcast %cst_65 : f32 to vector<16x128xf32>
    %213 = arith.mulf %212, %211 : vector<16x128xf32>
    %214 = arith.mulf %205, %197 : vector<16x128xf32>
    %215 = arith.addf %192, %214 : vector<16x128xf32>
    %216 = math.tanh %215 : vector<16x128xf32>
    %217 = arith.subf %184, %216 : vector<16x128xf32>
    %218 = arith.mulf %213, %217 : vector<16x128xf32>
    %219 = arith.addf %216, %218 : vector<16x128xf32>
    %c5 = arith.constant 5 : index
    %c0_66 = arith.constant 0 : index
    %c0_67 = arith.constant 0 : index
    %220 = vector.load %arg8[%c5, %c0_66, %c0_67] : memref<8x16x128xf32, #tpu.memory_space<vmem>>, vector<1x16x128xf32>
    %221 = vector.shape_cast %220 : vector<1x16x128xf32> to vector<16x128xf32>
    %222 = vector.shape_cast %219 : vector<16x128xf32> to vector<1x16x128xf32>
    tpu.vector_store %arg8[%c5, %c0_66, %c0_67], %222 {strides = array<i32>} : memref<8x16x128xf32, #tpu.memory_space<vmem>>, vector<1x16x128xf32>,
    %223 = vector.extract_strided_slice %9 {offsets = [96, 0], sizes = [16, 384], strides = [1, 1]} : vector<128x384xf32> to vector<16x384xf32>
    %cst_68 = arith.constant dense<0.000000e+00> : vector<16x384xf32>
    %224 = tpu.matmul %219, %10, %cst_68 {dimension_numbers = #tpu.dot_dimension_numbers<[1], [0], [0], [1], [0, 0, 1, 1], [], []>} : vector<16x128xf32>, vector<128x384xf32>, vector<16x384xf32> -> vector<16x384xf32>
    %225 = vector.extract_strided_slice %223 {offsets = [0, 0], sizes = [16, 128], strides = [1, 1]} : vector<16x384xf32> to vector<16x128xf32>
    %226 = vector.extract_strided_slice %223 {offsets = [0, 128], sizes = [16, 128], strides = [1, 1]} : vector<16x384xf32> to vector<16x128xf32>
    %227 = vector.extract_strided_slice %223 {offsets = [0, 256], sizes = [16, 128], strides = [1, 1]} : vector<16x384xf32> to vector<16x128xf32>
    %228 = vector.extract_strided_slice %224 {offsets = [0, 0], sizes = [16, 128], strides = [1, 1]} : vector<16x384xf32> to vector<16x128xf32>
    %229 = vector.extract_strided_slice %224 {offsets = [0, 128], sizes = [16, 128], strides = [1, 1]} : vector<16x384xf32> to vector<16x128xf32>
    %230 = vector.extract_strided_slice %224 {offsets = [0, 256], sizes = [16, 128], strides = [1, 1]} : vector<16x384xf32> to vector<16x128xf32>
    %231 = vector.broadcast %11 : vector<1x128xf32> to vector<16x128xf32>
    %232 = arith.addf %230, %231 : vector<16x128xf32>
    %233 = arith.addf %225, %228 : vector<16x128xf32>
    %cst_69 = arith.constant 5.000000e-01 : f32
    %234 = vector.broadcast %cst_69 : f32 to vector<16x128xf32>
    %235 = arith.mulf %234, %233 : vector<16x128xf32>
    %236 = math.tanh %235 : vector<16x128xf32>
    %cst_70 = arith.constant 1.000000e+00 : f32
    %237 = vector.broadcast %cst_70 : f32 to vector<16x128xf32>
    %238 = arith.addf %236, %237 : vector<16x128xf32>
    %cst_71 = arith.constant 5.000000e-01 : f32
    %239 = vector.broadcast %cst_71 : f32 to vector<16x128xf32>
    %240 = arith.mulf %239, %238 : vector<16x128xf32>
    %241 = arith.addf %226, %229 : vector<16x128xf32>
    %cst_72 = arith.constant 5.000000e-01 : f32
    %242 = vector.broadcast %cst_72 : f32 to vector<16x128xf32>
    %243 = arith.mulf %242, %241 : vector<16x128xf32>
    %244 = math.tanh %243 : vector<16x128xf32>
    %cst_73 = arith.constant 1.000000e+00 : f32
    %245 = vector.broadcast %cst_73 : f32 to vector<16x128xf32>
    %246 = arith.addf %244, %245 : vector<16x128xf32>
    %cst_74 = arith.constant 5.000000e-01 : f32
    %247 = vector.broadcast %cst_74 : f32 to vector<16x128xf32>
    %248 = arith.mulf %247, %246 : vector<16x128xf32>
    %249 = arith.mulf %240, %232 : vector<16x128xf32>
    %250 = arith.addf %227, %249 : vector<16x128xf32>
    %251 = math.tanh %250 : vector<16x128xf32>
    %252 = arith.subf %219, %251 : vector<16x128xf32>
    %253 = arith.mulf %248, %252 : vector<16x128xf32>
    %254 = arith.addf %251, %253 : vector<16x128xf32>
    %c6 = arith.constant 6 : index
    %c0_75 = arith.constant 0 : index
    %c0_76 = arith.constant 0 : index
    %255 = vector.load %arg8[%c6, %c0_75, %c0_76] : memref<8x16x128xf32, #tpu.memory_space<vmem>>, vector<1x16x128xf32>
    %256 = vector.shape_cast %255 : vector<1x16x128xf32> to vector<16x128xf32>
    %257 = vector.shape_cast %254 : vector<16x128xf32> to vector<1x16x128xf32>
    tpu.vector_store %arg8[%c6, %c0_75, %c0_76], %257 {strides = array<i32>} : memref<8x16x128xf32, #tpu.memory_space<vmem>>, vector<1x16x128xf32>,
    %258 = vector.extract_strided_slice %9 {offsets = [112, 0], sizes = [16, 384], strides = [1, 1]} : vector<128x384xf32> to vector<16x384xf32>
    %cst_77 = arith.constant dense<0.000000e+00> : vector<16x384xf32>
    %259 = tpu.matmul %254, %10, %cst_77 {dimension_numbers = #tpu.dot_dimension_numbers<[1], [0], [0], [1], [0, 0, 1, 1], [], []>} : vector<16x128xf32>, vector<128x384xf32>, vector<16x384xf32> -> vector<16x384xf32>
    %260 = vector.extract_strided_slice %258 {offsets = [0, 0], sizes = [16, 128], strides = [1, 1]} : vector<16x384xf32> to vector<16x128xf32>
    %261 = vector.extract_strided_slice %258 {offsets = [0, 128], sizes = [16, 128], strides = [1, 1]} : vector<16x384xf32> to vector<16x128xf32>
    %262 = vector.extract_strided_slice %258 {offsets = [0, 256], sizes = [16, 128], strides = [1, 1]} : vector<16x384xf32> to vector<16x128xf32>
    %263 = vector.extract_strided_slice %259 {offsets = [0, 0], sizes = [16, 128], strides = [1, 1]} : vector<16x384xf32> to vector<16x128xf32>
    %264 = vector.extract_strided_slice %259 {offsets = [0, 128], sizes = [16, 128], strides = [1, 1]} : vector<16x384xf32> to vector<16x128xf32>
    %265 = vector.extract_strided_slice %259 {offsets = [0, 256], sizes = [16, 128], strides = [1, 1]} : vector<16x384xf32> to vector<16x128xf32>
    %266 = vector.broadcast %11 : vector<1x128xf32> to vector<16x128xf32>
    %267 = arith.addf %265, %266 : vector<16x128xf32>
    %268 = arith.addf %260, %263 : vector<16x128xf32>
    %cst_78 = arith.constant 5.000000e-01 : f32
    %269 = vector.broadcast %cst_78 : f32 to vector<16x128xf32>
    %270 = arith.mulf %269, %268 : vector<16x128xf32>
    %271 = math.tanh %270 : vector<16x128xf32>
    %cst_79 = arith.constant 1.000000e+00 : f32
    %272 = vector.broadcast %cst_79 : f32 to vector<16x128xf32>
    %273 = arith.addf %271, %272 : vector<16x128xf32>
    %cst_80 = arith.constant 5.000000e-01 : f32
    %274 = vector.broadcast %cst_80 : f32 to vector<16x128xf32>
    %275 = arith.mulf %274, %273 : vector<16x128xf32>
    %276 = arith.addf %261, %264 : vector<16x128xf32>
    %cst_81 = arith.constant 5.000000e-01 : f32
    %277 = vector.broadcast %cst_81 : f32 to vector<16x128xf32>
    %278 = arith.mulf %277, %276 : vector<16x128xf32>
    %279 = math.tanh %278 : vector<16x128xf32>
    %cst_82 = arith.constant 1.000000e+00 : f32
    %280 = vector.broadcast %cst_82 : f32 to vector<16x128xf32>
    %281 = arith.addf %279, %280 : vector<16x128xf32>
    %cst_83 = arith.constant 5.000000e-01 : f32
    %282 = vector.broadcast %cst_83 : f32 to vector<16x128xf32>
    %283 = arith.mulf %282, %281 : vector<16x128xf32>
    %284 = arith.mulf %275, %267 : vector<16x128xf32>
    %285 = arith.addf %262, %284 : vector<16x128xf32>
    %286 = math.tanh %285 : vector<16x128xf32>
    %287 = arith.subf %254, %286 : vector<16x128xf32>
    %288 = arith.mulf %283, %287 : vector<16x128xf32>
    %289 = arith.addf %286, %288 : vector<16x128xf32>
    %c7 = arith.constant 7 : index
    %c0_84 = arith.constant 0 : index
    %c0_85 = arith.constant 0 : index
    %290 = vector.load %arg8[%c7, %c0_84, %c0_85] : memref<8x16x128xf32, #tpu.memory_space<vmem>>, vector<1x16x128xf32>
    %291 = vector.shape_cast %290 : vector<1x16x128xf32> to vector<16x128xf32>
    %292 = vector.shape_cast %289 : vector<16x128xf32> to vector<1x16x128xf32>
    tpu.vector_store %arg8[%c7, %c0_84, %c0_85], %292 {strides = array<i32>} : memref<8x16x128xf32, #tpu.memory_space<vmem>>, vector<1x16x128xf32>,
    %c0_86 = arith.constant 0 : index
    %c0_87 = arith.constant 0 : index
    %293 = vector.load %arg9[%c0_86, %c0_87] : memref<16x128xf32, #tpu.memory_space<vmem>>, vector<16x128xf32>
    tpu.vector_store %arg9[%c0_86, %c0_87], %289 {strides = array<i32>} : memref<16x128xf32, #tpu.memory_space<vmem>>, vector<16x128xf32>,
    return
  }
  func.func @transform_0(%arg0: i32, %arg1: i32) -> (i32, i32, i32) {
    %c0_i32 = arith.constant 0 : i32
    %c0_i32_0 = arith.constant 0 : i32
    return %arg1, %arg0, %c0_i32 : i32, i32, i32
  }
  func.func @transform_1(%arg0: i32, %arg1: i32) -> (i32, i32) {
    %c0_i32 = arith.constant 0 : i32
    %c0_i32_0 = arith.constant 0 : i32
    return %arg0, %c0_i32 : i32, i32
  }
  func.func @transform_2(%arg0: i32, %arg1: i32) -> (i32, i32) {
    %c0_i32 = arith.constant 0 : i32
    %c0_i32_0 = arith.constant 0 : i32
    %c0_i32_1 = arith.constant 0 : i32
    return %c0_i32, %c0_i32_0 : i32, i32
  }
  func.func @transform_3(%arg0: i32, %arg1: i32) -> (i32, i32) {
    %c0_i32 = arith.constant 0 : i32
    %c0_i32_0 = arith.constant 0 : i32
    %c0_i32_1 = arith.constant 0 : i32
    return %c0_i32, %c0_i32_0 : i32, i32
  }
  func.func @transform_4(%arg0: i32, %arg1: i32) -> (i32, i32) {
    %c0_i32 = arith.constant 0 : i32
    %c0_i32_0 = arith.constant 0 : i32
    %c0_i32_1 = arith.constant 0 : i32
    return %c0_i32, %c0_i32_0 : i32, i32
  }
  func.func @transform_5(%arg0: i32, %arg1: i32) -> (i32, i32) {
    %c0_i32 = arith.constant 0 : i32
    %c0_i32_0 = arith.constant 0 : i32
    %c0_i32_1 = arith.constant 0 : i32
    return %c0_i32, %c0_i32_0 : i32, i32
  }
  func.func @transform_6(%arg0: i32, %arg1: i32) -> (i32, i32, i32) {
    %c0_i32 = arith.constant 0 : i32
    %c0_i32_0 = arith.constant 0 : i32
    return %arg1, %arg0, %c0_i32 : i32, i32, i32
  }
}

</mosaic_0001>

<bundles_post_ra>
// kernel: tpu_custom_call.1
= control target key start
LH: loop header
LB: loop body
LE: loop exit
PB: predicated region body
PF: predicated region fallthrough
CT: control target
= control target key end

     0   :  { %11 = vsyncpa [#allocation4], 0  ;;  %s4131_s0 = inlined_call_operand.hbm [shape: f32[8,16,16], index: 0, kind: input, shape index: {}]   ;;  %s4132_s1 = inlined_call_operand.hbm [shape: f32[16,128], index: 1, kind: input, shape index: {}]   ;;  %s4133_s2 = inlined_call_operand.hbm [shape: f32[16,384], index: 2, kind: input, shape index: {}]   ;;  %s4134_s3 = inlined_call_operand.hbm [shape: f32[128,384], index: 3, kind: input, shape index: {}]   ;;  %s4135_s4 = inlined_call_operand.vmem [shape: f32[1,384], index: 4, kind: input, shape index: {}]   ;;  %s4136_s5 = inlined_call_operand.vmem [shape: f32[1,128], index: 5, kind: input, shape index: {}]   ;;  %s4137_s6 = inlined_call_operand.hbm [shape: f32[8,16,128], index: 6, kind: output, shape index: {}]  }
   0x1   :  { %12 = vsyncpa [#allocation7], 0 }
   0x2   :  { %13 = vsyncpa [#allocation10], 0 }
   0x3   :  { %14 = vsyncpa [#allocation5], 0  ;;  %s3384_s21 = smov [#allocation6]   ;;  %s3385_s23 = smov [#allocation3]  }
   0x4   :  { %s32_s22 = sshll.u32 %s3384_s21, 4  ;;  %s20_s24 = sshll.u32 %s3385_s23, 4  ;;  %s33_s22 = int_to_ptr.vmem [resolvable:$true] %s32_s22  ;;  %s3429_s24 = int_to_ptr.vmem [resolvable:$true] %s20_s24 }
   0x5   :  { %s3266_s27 = scalar_lea.hbm %s4132_s1, 256 }
   0x6   :  { %p3267_p0 = scmp.ne.s32.totalorder %s4132_s1, %s3266_s27  ;;  %p3270_p1 = scmp.lt.u32.totalorder %s3266_s27, %s4132_s1 }
   0x8   :  { %p3272_p2 = pnand %p3270_p1, %p3267_p0 }
   0xa   :  { %3275 = shalt.err (!%p3272_p2)
}
   0xb   :  { %s3276_s8 = scalar_lea.vmem %s33_s22, 256  ;;  %p3281_p4 = scmp.lt.s32.totalorder %s33_s22, %s33_s22 }
   0xc   :  { %p3277_p3 = scmp.ne.s32.totalorder %s33_s22, %s3276_s8  ;;  %p3282_p5 = scmp.lt.s32.totalorder %s3276_s8, %s3276_s8 }
   0xe   :  { %p3283_p6 = por %p3282_p5, %p3281_p4 }
  0x10   :  { %p3284_p7 = pnand %p3283_p6, %p3277_p3 }
  0x12   :  { %3287 = shalt.err (!%p3284_p7)
}
  0x13   :  { %s3386_s9 = smov 128   ;;  %s3387_s10 = smov 8  }
  0x14   :  { %38 = dma.hbm_to_vmem [thread:$0]  %s4132_s1, 256, %s33_s22, [#allocation7], %s3386_s9, %s3386_s9, %s3387_s10  }
  0x15   :  { %s3288_s15 = scalar_lea.hbm %s4131_s0, 2048 }
  0x16   :  { %p3289_p8 = scmp.ne.s32.totalorder %s4131_s0, %s3288_s15  ;;  %p3292_p9 = scmp.lt.u32.totalorder %s3288_s15, %s4131_s0 }
  0x18   :  { %p3294_p10 = pnand %p3292_p9, %p3289_p8 }
  0x1a   :  { %3297 = shalt.err (!%p3294_p10)
}
  0x1b   :  { %s3298_s20 = scalar_lea.vmem %s3429_s24, 2048  ;;  %p3303_p12 = scmp.lt.s32.totalorder %s3429_s24, %s3429_s24 }
  0x1c   :  { %p3299_p11 = scmp.ne.s32.totalorder %s3429_s24, %s3298_s20  ;;  %p3304_p13 = scmp.lt.s32.totalorder %s3298_s20, %s3298_s20 }
  0x1e   :  { %p3305_p0 = por %p3304_p13, %p3303_p12 }
  0x20   :  { %p3306_p1 = pnand %p3305_p0, %p3299_p11 }
  0x22   :  { %3309 = shalt.err (!%p3306_p1)
}
  0x23   :  { %26 = dma.hbm_to_vmem [thread:$0]  %s4131_s0, 2048, %s3429_s24, [#allocation4], %s3386_s9, %s3386_s9, %s3387_s10  }
  0x24   :  { %s3388_s22 = smov [#allocation8]   ;;  %s3310_s27 = scalar_lea.hbm %s4133_s2, 768 }
  0x25   :  { %s44_s23 = sshll.u32 %s3388_s22, 4  ;;  %p3311_p2 = scmp.ne.s32.totalorder %s4133_s2, %s3310_s27  ;;  %s45_s23 = int_to_ptr.vmem [resolvable:$true] %s44_s23 }
  0x26   :  { %p3314_p3 = scmp.lt.u32.totalorder %s3310_s27, %s4133_s2 }
  0x28   :  { %p3316_p4 = pnand %p3314_p3, %p3311_p2 }
  0x2a   :  { %3319 = shalt.err (!%p3316_p4)
}
  0x2b   :  { %s3320_s8 = scalar_lea.vmem %s45_s23, 768  ;;  %p3325_p6 = scmp.lt.s32.totalorder %s45_s23, %s45_s23 }
  0x2c   :  { %p3321_p5 = scmp.ne.s32.totalorder %s45_s23, %s3320_s8  ;;  %p3326_p7 = scmp.lt.s32.totalorder %s3320_s8, %s3320_s8 }
  0x2e   :  { %p3327_p8 = por %p3326_p7, %p3325_p6 }
  0x30   :  { %p3328_p9 = pnand %p3327_p8, %p3321_p5 }
  0x32   :  { %3331 = shalt.err (!%p3328_p9)
}
  0x33   :  { %s3389_s0 = smov 384   ;;  %s3390_s24 = smov 24  }
  0x34   :  { %50 = dma.hbm_to_vmem [thread:$0]  %s4133_s2, 768, %s45_s23, [#allocation7], %s3389_s0, %s3389_s0, %s3390_s24  }
  0x35   :  { %s3391_s13 = smov [#allocation9]   ;;  %s3332_s17 = scalar_lea.hbm %s4134_s3, 6144 }
  0x36   :  { %s56_s14 = sshll.u32 %s3391_s13, 4  ;;  %p3333_p10 = scmp.ne.s32.totalorder %s4134_s3, %s3332_s17  ;;  %s57_s14 = int_to_ptr.vmem [resolvable:$true] %s56_s14 }
  0x37   :  { %p3336_p11 = scmp.lt.u32.totalorder %s3332_s17, %s4134_s3 }
  0x39   :  { %p3338_p12 = pnand %p3336_p11, %p3333_p10 }
  0x3b   :  { %3341 = shalt.err (!%p3338_p12)
}
  0x3c   :  { %s3342_s21 = scalar_lea.vmem %s57_s14, 6144  ;;  %p3347_p0 = scmp.lt.s32.totalorder %s57_s14, %s57_s14 }
  0x3d   :  { %p3343_p13 = scmp.ne.s32.totalorder %s57_s14, %s3342_s21  ;;  %p3348_p1 = scmp.lt.s32.totalorder %s3342_s21, %s3342_s21 }
  0x3f   :  { %p3349_p2 = por %p3348_p1, %p3347_p0 }
  0x41   :  { %p3350_p3 = pnand %p3349_p2, %p3343_p13 }
  0x43   :  { %3353 = shalt.err (!%p3350_p3)
}
  0x44   :  { %62 = dma.hbm_to_vmem [thread:$0]  %s4134_s3, 6144, %s57_s14, [#allocation10], %s3389_s0, %s3389_s0, %s3390_s24  }
  0x45   :  { %3376 = dma.done.wait [#allocation4], 2048  }
  0x46   :  { %3377 = vsyncadd [#allocation4], 4294965248 }
  0x47   :  { %3378 = dma.done.wait [#allocation7], 1024  }
  0x48   :  { %3379 = vsyncadd [#allocation7], 4294966272 }
  0x49   :  { %3380 = dma.done.wait [#allocation10], 6144  }
  0x4a   :  { %3381 = vsyncadd [#allocation10], 4294961152  ;;  %v4138_v0 = vmov 0.0   ;;  %v104_v1 = vld [vmem:[#allocation8 + $0x8] sm:$0xff]  ;;  %v107_v2 = vld [vmem:[#allocation8 + $0x20] sm:$0xff]  ;;  %vm126_vm0 = vcmask 130048  }
  0x4b   :  { %239 = vmatprep.mubr.f32.mxu0 %v4138_v0  ;;  %311 = vmatprep.mubr.f32.mxu1 %v4138_v0  ;;  %v103_v3 = vld [vmem:[#allocation8] sm:$0xff]  ;;  %v2573_v4 = vpack.c.bf16 %v107_v2, %v104_v1  ;;  %v106_v5 = vld [vmem:[#allocation8 + $0x18] sm:$0xff]  ;;  %v485_v8 = vld [vmem:[#allocation9 + $0x20] sm:$0xff] }
  0x4c   :  { %v482_v6 = vld [vmem:[#allocation9 + $0x8] sm:$0xff]  ;;  %v2575_v7 = vpack.c.bf16 %v106_v5, %v103_v3  ;;  %v481_v9 = vld [vmem:[#allocation9] sm:$0xff]  ;;  %v484_v10 = vld [vmem:[#allocation9 + $0x18] sm:$0xff] }
  0x4d   :  { %2574 = vmatprep.subr.bf16.mxu0 %v2573_v4  ;;  %v3492_v11 = vpack.c.bf16 %v485_v8, %v482_v6  ;;  %v488_v12 = vld [vmem:[#allocation9 + $0x38] sm:$0xff]  ;;  %v491_v13 = vld [vmem:[#allocation9 + $0x50] sm:$0xff]  ;;  %3093 = vmatprep.subr.bf16.mxu1 %v2573_v4  ;;  %v3494_v14 = vld [vmem:[#allocation3] sm:$0xff]  ;;  %v3496_v15 = vpack.c.bf16 %v484_v10, %v481_v9 }
  0x4e   :  { %2576 = vmatpush1.bf16.msra.mxu0 %v2575_v7  ;;  %3094 = vmatpush1.bf16.msra.mxu1 %v2575_v7  ;;  %v3499_v16 = vpack.c.bf16 %v491_v13, %v488_v12  ;;  %v487_v17 = vld [vmem:[#allocation9 + $0x30] sm:$0xff]  ;;  %v490_v18 = vld [vmem:[#allocation9 + $0x48] sm:$0xff]  ;;  %v497_v20 = vld [vmem:[#allocation9 + $0x80] sm:$0xff] }
  0x4f   :  { %2582 = vmatprep.subr.bf16.mxu0 %v3492_v11  ;;  %v494_v19 = vld [vmem:[#allocation9 + $0x68] sm:$0xff]  ;;  %v3503_v21 = vld [vmem:[#allocation3 + $0x60] sm:$0xff]  ;;  %v108_v23 = vld [vmem:[#allocation8 + $0x28] sm:$0xff]  ;;  %v3509_v25 = vpack.c.bf16 %v490_v18, %v487_v17 }
  0x50   :  { %v105_v22 = vld [vmem:[#allocation8 + $0x10] sm:$0xff]  ;;  %v3507_v24 = vld [vmem:[#allocation3 + $0x8] sm:$0xff]  ;;  %v3512_v27 = vpack.c.bf16 %v497_v20, %v494_v19  ;;  %v496_v29 = vld [vmem:[#allocation9 + $0x78] sm:$0xff] }
  0x51   :  { %2070 = vmatmul.mubr.msk.f32.vlgmr.msra.gmra.mrb[0].mxu0 %vm126_vm0, %v3494_v14  ;;  %v2577_v26 = vpack.c.bf16 %v108_v23, %v105_v22  ;;  %v493_v28 = vld [vmem:[#allocation9 + $0x60] sm:$0xff]  ;;  %2082 = vmatmul.mubr.msk.f32.vlgmr.msra.gmra.mrb[0].mxu1 %vm126_vm0, %v3503_v21  ;;  %v500_v30 = vld [vmem:[#allocation9 + $0x98] sm:$0xff]  ;;  %v503_v31 = vld [vmem:[#allocation9 + $0xb0] sm:$0xff] }
  0x52   :  { %2584 = vmatpush1.bf16.msra.mxu0 %v3496_v15  ;;  %245 = vmatprep.mubr.f32.mxu0 %v4138_v0  ;;  %v3517_v32 = vld [vmem:[#allocation3 + $0x68] sm:$0xff]  ;;  %v89_v33 = vld [vmem:[#allocation3 + $0x10] sm:$0xff]  ;;  %v3523_v34 = vpack.c.bf16 %v496_v29, %v493_v28  ;;  %v3526_v36 = vpack.c.bf16 %v503_v31, %v500_v30  ;;  %v509_v40 = vld [vmem:[#allocation9 + $0xe0] sm:$0xff] }
  0x53   :  { %2586 = vmatprep.subr.bf16.mxu0 %v3499_v16  ;;  %2578 = vmatprep.subr.bf16.mxu1 %v2577_v26  ;;  %v499_v35 = vld [vmem:[#allocation9 + $0x90] sm:$0xff]  ;;  %v502_v37 = vld [vmem:[#allocation9 + $0xa8] sm:$0xff]  ;;  %v90_v44 = vld [vmem:[#allocation3 + $0x18] sm:$0xff] }
  0x54   :  { %317 = vmatprep.mubr.f32.mxu1 %v4138_v0  ;;  %2580 = vmatpush3.bf16.msra.mxu1 %v2577_v26  ;;  %v3530_v38 = vld [vmem:[#allocation3 + $0x70] sm:$0xff]  ;;  %v506_v39 = vld [vmem:[#allocation9 + $0xc8] sm:$0xff]  ;;  %v3538_v45 = vpack.c.bf16 %v502_v37, %v499_v35  ;;  %v505_v47 = vld [vmem:[#allocation9 + $0xc0] sm:$0xff] }
  0x55   :  { %2071 = vmatmul.mubr.msk.f32.gmra.mrb[2].mxu0 %vm126_vm0, %v3507_v24  ;;  %2083 = vmatmul.mubr.msk.f32.gmra.mrb[2].mxu1 %vm126_vm0, %v3517_v32  ;;  %v483_v41 = vld [vmem:[#allocation9 + $0x10] sm:$0xff]  ;;  %v486_v42 = vld [vmem:[#allocation9 + $0x28] sm:$0xff]  ;;  %v3543_v46 = vpack.c.bf16 %v509_v40, %v506_v39  ;;  %v508_v48 = vld [vmem:[#allocation9 + $0xd8] sm:$0xff] }
  0x56   :  { %251 = vmatprep.mubr.f32.mxu0 %v4138_v0  ;;  %2588 = vmatpush1.bf16.msra.mxu0 %v3509_v25  ;;  %v3534_v43 = vpack.c.bf16 %v486_v42, %v483_v41  ;;  %v3546_v49 = vld [vmem:[#allocation3 + $0x78] sm:$0xff]  ;;  %v515_v51 = vld [vmem:[#allocation9 + $0x110] sm:$0xff]  ;;  %v91_v52 = vld [vmem:[#allocation3 + $0x20] sm:$0xff]  ;;  %v3552_v53 = vpack.c.bf16 %v508_v48, %v505_v47 }
  0x57   :  { %2590 = vmatprep.subr.bf16.mxu0 %v3512_v27  ;;  %323 = vmatprep.mubr.f32.mxu1 %v4138_v0  ;;  %v512_v50 = vld [vmem:[#allocation9 + $0xf8] sm:$0xff]  ;;  %v489_v54 = vld [vmem:[#allocation9 + $0x40] sm:$0xff]  ;;  %v511_v57 = vld [vmem:[#allocation9 + $0xf0] sm:$0xff] }
  0x58   :  { %2614 = vmatprep.subr.bf16.mxu1 %v3534_v43  ;;  %v492_v55 = vld [vmem:[#allocation9 + $0x58] sm:$0xff]  ;;  %v3557_v56 = vpack.c.bf16 %v515_v51, %v512_v50  ;;  %v514_v58 = vld [vmem:[#allocation9 + $0x108] sm:$0xff]  ;;  %v521_v60 = vld [vmem:[#allocation9 + $0x140] sm:$0xff] }
  0x59   :  { %2072 = vmatmul.mubr.msk.f32.gmra.mrb[4].mxu0 %vm126_vm0, %v89_v33  ;;  %2084 = vmatmul.mubr.msk.f32.gmra.mrb[4].mxu1 %vm126_vm0, %v3530_v38  ;;  %v518_v59 = vld [vmem:[#allocation9 + $0x128] sm:$0xff]  ;;  %v3562_v61 = vpack.c.bf16 %v492_v55, %v489_v54  ;;  %v3566_v63 = vpack.c.bf16 %v514_v58, %v511_v57  ;;  %v495_v1 = vld [vmem:[#allocation9 + $0x70] sm:$0xff]  ;;  %v517_v4 = vld [vmem:[#allocation9 + $0x120] sm:$0xff] }
  0x5a   :  { %257 = vmatprep.mubr.f32.mxu0 %v4138_v0  ;;  %2592 = vmatpush1.bf16.msra.mxu0 %v3523_v34  ;;  %v92_v62 = vld [vmem:[#allocation3 + $0x28] sm:$0xff]  ;;  %v3571_v3 = vpack.c.bf16 %v521_v60, %v518_v59  ;;  %v520_v5 = vld [vmem:[#allocation9 + $0x138] sm:$0xff]  ;;  %v527_v7 = vld [vmem:[#allocation9 + $0x170] sm:$0xff] }
  0x5b   :  { %2594 = vmatprep.subr.bf16.mxu0 %v3526_v36  ;;  %329 = vmatprep.mubr.f32.mxu1 %v4138_v0  ;;  %v498_v2 = vld [vmem:[#allocation9 + $0x88] sm:$0xff]  ;;  %v524_v6 = vld [vmem:[#allocation9 + $0x158] sm:$0xff]  ;;  %v93_v9 = vld [vmem:[#allocation3 + $0x30] sm:$0xff]  ;;  %v3581_v10 = vpack.c.bf16 %v520_v5, %v517_v4 }
  0x5c   :  { %v3577_v8 = vpack.c.bf16 %v498_v2, %v495_v1  ;;  %v501_v12 = vld [vmem:[#allocation9 + $0xa0] sm:$0xff]  ;;  %v504_v13 = vld [vmem:[#allocation9 + $0xb8] sm:$0xff]  ;;  %v523_v17 = vld [vmem:[#allocation9 + $0x150] sm:$0xff] }
  0x5d   :  { %2073 = vmatmul.mubr.msk.f32.gmra.mrb[6].mxu0 %vm126_vm0, %v90_v44  ;;  %2085 = vmatmul.mubr.msk.f32.gmra.mrb[6].mxu1 %vm126_vm0, %v3546_v49  ;;  %v526_v18 = vld [vmem:[#allocation9 + $0x168] sm:$0xff]  ;;  %v3591_v19 = vpack.c.bf16 %v504_v13, %v501_v12  ;;  %v94_v20 = vld [vmem:[#allocation3 + $0x38] sm:$0xff]  ;;  %v507_v23 = vld [vmem:[#allocation9 + $0xd0] sm:$0xff] }
  0x5e   :  { %263 = vmatprep.mubr.f32.mxu0 %v4138_v0  ;;  %2596 = vmatpush1.bf16.msra.mxu0 %v3538_v45  ;;  %v3595_v22 = vpack.c.bf16 %v526_v18, %v523_v17  ;;  %v95_v28 = vld [vmem:[#allocation3 + $0x40] sm:$0xff]  ;;  %v516_v30 = vld [vmem:[#allocation9 + $0x118] sm:$0xff]  ;;  %v519_v35 = vld [vmem:[#allocation9 + $0x130] sm:$0xff] }
  0x5f   :  { %2598 = vmatprep.subr.bf16.mxu0 %v3543_v46  ;;  %2269 = vmatprep.mubr.msk.f32.mxu1 %vm126_vm0, %v3494_v14  ;;  %v3585_v14 = vpack.c.bf16 %v527_v7, %v524_v6  ;;  %v513_v29 = vld [vmem:[#allocation9 + $0x100] sm:$0xff]  ;;  %v522_v37 = vld [vmem:[#allocation9 + $0x148] sm:$0xff]  ;;  %v97_v39 = vld [vmem:[#allocation3 + $0x50] sm:$0xff] }
  0x60   :  { %v3613_v31 = vpack.c.bf16 %v516_v30, %v513_v29  ;;  %v3621_v40 = vpack.c.bf16 %v522_v37, %v519_v35  ;;  %v98_v41 = vld [vmem:[#allocation3 + $0x58] sm:$0xff]  ;;  %v525_v42 = vld [vmem:[#allocation9 + $0x160] sm:$0xff] }
  0x61   :  { %2074 = vmatmul.mubr.msk.f32.gmra.mrb[8].mxu0 %vm126_vm0, %v91_v52  ;;  %2270 = vmatmul.mubr.msk.f32.vlgmr.msra.gmra.mrb[8].mxu1 %vm126_vm0, %v3507_v24  ;;  %v510_v24 = vld [vmem:[#allocation9 + $0xe8] sm:$0xff]  ;;  %v109_v1 = vld [vmem:[%s4135_s4] sm:$0x7] }
  0x62   :  { %269 = vmatprep.mubr.f32.mxu0 %v4138_v0  ;;  %2600 = vmatpush1.bf16.msra.mxu0 %v3552_v53  ;;  %v3603_v26 = vpack.c.bf16 %v510_v24, %v507_v23 }
  0x63   :  { %2602 = vmatprep.subr.bf16.mxu0 %v3557_v56  ;;  %2616 = vmatpush3.bf16.msra.mxu1 %v3534_v43 }
  0x64   :  { %2272 = vmatprep.mubr.msk.f32.mxu1 %vm126_vm0, %v89_v33  ;;  %2618 = vmatprep.subr.bf16.mxu1 %v3562_v61  ;;  %v96_v33 = vld [vmem:[#allocation3 + $0x48] sm:$0xff] }
  0x65   :  { %2075 = vmatmul.mubr.msk.f32.gmra.mrb[10].mxu0 %vm126_vm0, %v92_v62  ;;  %2273 = vmatmul.mubr.msk.f32.gmra.mrb[10].mxu1 %vm126_vm0, %v90_v44  ;;  %v528_v44 = vld [vmem:[#allocation9 + $0x178] sm:$0xff] }
  0x66   :  { %275 = vmatprep.mubr.f32.mxu0 %v4138_v0  ;;  %2604 = vmatpush1.bf16.msra.mxu0 %v3566_v63  ;;  %v3630_v47 = vpack.c.bf16 %v528_v44, %v525_v42 }
  0x67   :  { %2606 = vmatprep.subr.bf16.mxu0 %v3571_v3  ;;  %2620 = vmatpush3.bf16.msra.mxu1 %v3562_v61 }
  0x68   :  { %2275 = vmatprep.mubr.msk.f32.mxu1 %vm126_vm0, %v91_v52  ;;  %2622 = vmatprep.subr.bf16.mxu1 %v3577_v8  ;;  %v111_v52 = vlaneseq }
  0x69   :  { %2076 = vmatmul.mubr.msk.f32.gmra.mrb[12].mxu0 %vm126_vm0, %v93_v9  ;;  %2276 = vmatmul.mubr.msk.f32.gmra.mrb[12].mxu1 %vm126_vm0, %v92_v62 }
  0x6a   :  { %281 = vmatprep.mubr.f32.mxu0 %v4138_v0  ;;  %2608 = vmatpush1.bf16.msra.mxu0 %v3581_v10  ;;  %v112_v57 = vshrl.u32 %v111_v52, 7 }
  0x6b   :  { %2610 = vmatprep.subr.bf16.mxu0 %v3585_v14  ;;  %2624 = vmatpush3.bf16.msra.mxu1 %v3577_v8 }
  0x6c   :  { %2278 = vmatprep.mubr.msk.f32.mxu1 %vm126_vm0, %v93_v9  ;;  %2626 = vmatprep.subr.bf16.mxu1 %v3591_v19  ;;  %v121_v59 = vsub.s32 2, %v112_v57  ;;  %v113_v44 = vsub.s32 0, %v112_v57 }
  0x6d   :  { %2077 = vmatmul.mubr.msk.f32.gmra.mrb[14].mxu0 %vm126_vm0, %v94_v20  ;;  %2279 = vmatmul.mubr.msk.f32.gmra.mrb[14].mxu1 %vm126_vm0, %v94_v20 }
  0x6e   :  { %287 = vmatprep.mubr.f32.mxu0 %v4138_v0  ;;  %2612 = vmatpush1.bf16.msra.mxu0 %v3595_v22  ;;  %v3708_v2 = vrot.slane %v109_v1, %v121_v59 }
  0x6f   :  { %2646 = vmatprep.subr.bf16.mxu0 %v3492_v11  ;;  %2628 = vmatpush3.bf16.msra.mxu1 %v3591_v19 }
  0x70   :  { %2281 = vmatprep.mubr.msk.f32.mxu1 %vm126_vm0, %v95_v28  ;;  %2630 = vmatprep.subr.bf16.mxu1 %v3603_v26 }
  0x71   :  { %2078 = vmatmul.mubr.msk.f32.gmra.mrb[16].mxu0 %vm126_vm0, %v95_v28  ;;  %2282 = vmatmul.mubr.msk.f32.gmra.mrb[16].mxu1 %vm126_vm0, %v96_v33 }
  0x72   :  { %293 = vmatprep.mubr.f32.mxu0 %v4138_v0  ;;  %2284 = vmatprep.mubr.msk.f32.mxu1 %vm126_vm0, %v97_v39 }
  0x73   :  { %2632 = vmatpush3.bf16.msra.mxu1 %v3603_v26 }
  0x74   :  { %2634 = vmatprep.subr.bf16.mxu1 %v3613_v31 }
  0x75   :  { %2079 = vmatmul.mubr.msk.f32.gmra.mrb[18].mxu0 %vm126_vm0, %v96_v33  ;;  %2285 = vmatmul.mubr.msk.f32.gmra.mrb[18].mxu1 %vm126_vm0, %v98_v41 }
  0x76   :  { %299 = vmatprep.mubr.f32.mxu0 %v4138_v0  ;;  %2287 = vmatprep.mubr.msk.f32.mxu1 %vm126_vm0, %v3503_v21  ;;  %v3641_v21 = vld [vmem:[#allocation6] sm:$0xff] }
  0x77   :  { %2636 = vmatpush3.bf16.msra.mxu1 %v3613_v31 }
  0x78   :  { %2638 = vmatprep.subr.bf16.mxu1 %v3621_v40 }
  0x79   :  { %2080 = vmatmul.mubr.msk.f32.gmra.mrb[20].mxu0 %vm126_vm0, %v97_v39  ;;  %2288 = vmatmul.mubr.msk.f32.gmra.mrb[20].mxu1 %vm126_vm0, %v3517_v32  ;;  %v3650_v32 = vld [vmem:[#allocation6 + $0x8] sm:$0xff] }
  0x7a   :  { %305 = vmatprep.mubr.f32.mxu0 %v4138_v0  ;;  %2290 = vmatprep.mubr.msk.f32.mxu1 %vm126_vm0, %v3530_v38 }
  0x7b   :  { %2640 = vmatpush3.bf16.msra.mxu1 %v3621_v40 }
  0x7c   :  { %2642 = vmatprep.subr.bf16.mxu1 %v3630_v47 }
  0x7d   :  { %2081 = vmatmul.mubr.msk.f32.gmra.mrb[22].mxu0 %vm126_vm0, %v98_v41  ;;  %2291 = vmatmul.mubr.msk.f32.gmra.mrb[22].mxu1 %vm126_vm0, %v3546_v49 }
  0x7e   :  { %596 = vmatprep.mubr.f32.mxu0 %v4138_v0  ;;  %2325 = vmatprep.mubr.f32.mxu1 %v3641_v21 }
  0x7f   :  { %2644 = vmatpush3.bf16.msra.mxu1 %v3630_v47 }
  0x80   :  { %2678 = vmatprep.subr.bf16.mxu1 %v3534_v43 }
  0x81   :  { %597 = vmatmul.mubr.f32.vlgmr.msra.gmra.mrb[0].mxu0 %v3641_v21 }
  0x82   :  { %602 = vmatprep.mubr.f32.mxu0 %v4138_v0  ;;  %2648 = vmatpush1.bf16.msra.mxu0 %v3496_v15 }
  0x83   :  { %2326 = vmatmul.mubr.f32.vlgmr.msra.gmra.mrb[24].mxu1 %v3650_v32  ;;  %2650 = vmatprep.subr.bf16.mxu0 %v3499_v16 }
  0x84   :  { %2680 = vmatpush3.bf16.msra.mxu1 %v3534_v43 }
  0x85   :  { %603 = vmatmul.mubr.f32.gmra.mrb[2].mxu0 %v3650_v32  ;;  %2682 = vmatprep.subr.bf16.mxu1 %v3562_v61 }
  0x86   :  { %2652 = vmatpush1.bf16.msra.mxu0 %v3509_v25  ;;  %790 = vmatprep.mubr.f32.mxu0 %v4138_v0 }
  0x87   :  { %2654 = vmatprep.subr.bf16.mxu0 %v3512_v27 }
  0x88   :  { %2684 = vmatpush3.bf16.msra.mxu1 %v3562_v61 }
  0x89   :  { %2686 = vmatprep.subr.bf16.mxu1 %v3577_v8 }
  0x8a   :  { %2656 = vmatpush1.bf16.msra.mxu0 %v3523_v34 }
  0x8b   :  { %2658 = vmatprep.subr.bf16.mxu0 %v3526_v36 }
  0x8c   :  { %2688 = vmatpush3.bf16.msra.mxu1 %v3577_v8 }
  0x8d   :  { %2690 = vmatprep.subr.bf16.mxu1 %v3591_v19 }
  0x8e   :  { %2660 = vmatpush1.bf16.msra.mxu0 %v3538_v45 }
  0x8f   :  { %2662 = vmatprep.subr.bf16.mxu0 %v3543_v46 }
  0x90   :  { %2692 = vmatpush3.bf16.msra.mxu1 %v3591_v19 }
  0x91   :  { %2694 = vmatprep.subr.bf16.mxu1 %v3603_v26 }
  0x92   :  { %2664 = vmatpush1.bf16.msra.mxu0 %v3552_v53 }
  0x93   :  { %2666 = vmatprep.subr.bf16.mxu0 %v3557_v56 }
  0x94   :  { %2696 = vmatpush3.bf16.msra.mxu1 %v3603_v26 }
  0x95   :  { %2698 = vmatprep.subr.bf16.mxu1 %v3613_v31 }
  0x96   :  { %2668 = vmatpush1.bf16.msra.mxu0 %v3566_v63 }
  0x97   :  { %2670 = vmatprep.subr.bf16.mxu0 %v3571_v3 }
  0x98   :  { %2700 = vmatpush3.bf16.msra.mxu1 %v3613_v31 }
  0x99   :  { %2702 = vmatprep.subr.bf16.mxu1 %v3621_v40 }
  0x9a   :  { %2672 = vmatpush1.bf16.msra.mxu0 %v3581_v10 }
  0x9b   :  { %2674 = vmatprep.subr.bf16.mxu0 %v3585_v14 }
  0x9c   :  { %2704 = vmatpush3.bf16.msra.mxu1 %v3621_v40 }
  0x9d   :  { %2706 = vmatprep.subr.bf16.mxu1 %v3630_v47 }
  0x9e   :  { %2676 = vmatpush1.bf16.msra.mxu0 %v3595_v22 }
  0x9f   :  { %2710 = vmatprep.subr.bf16.mxu0 %v3492_v11 }
  0xa0   :  { %2708 = vmatpush3.bf16.msra.mxu1 %v3630_v47 }
  0xa1   :  { %2742 = vmatprep.subr.bf16.mxu1 %v3534_v43 }
 0x124   :  { %v3687_v38 = vpop.f32.mrb[0].mxu1 }
 0x125   :  { %v3689_v48 = vpop.f32.mrb[1].mxu1 }
 0x128   :  { %v3691_v49 = vpop.f32.mrb[2].mxu1 }
 0x129   :  { %v3693_v50 = vpop.f32.mrb[3].mxu1 }
 0x12a   :  { %4140 = vst [vmem:[#allocation16_spill] sm:$0xff] %v3693_v50 }
 0x12c   :  { %v3695_v51 = vpop.f32.mrb[4].mxu1 }
 0x12d   :  { %4141 = vst [vmem:[#allocation17_spill] sm:$0xff] %v3695_v51  ;;  %v3697_v54 = vpop.f32.mrb[5].mxu1 }
 0x12e   :  { %4142 = vst [vmem:[#allocation18_spill] sm:$0xff] %v3697_v54 }
 0x130   :  { %v3699_v55 = vpop.f32.mrb[6].mxu1 }
 0x131   :  { %4143 = vst [vmem:[#allocation19_spill] sm:$0xff] %v3699_v55  ;;  %v3701_v58 = vpop.f32.mrb[7].mxu1 }
 0x132   :  { %4144 = vst [vmem:[#allocation20_spill] sm:$0xff] %v3701_v58  ;;  %v117_v58 = vsub.s32 1, %v112_v57 }
 0x134   :  { %v3703_v60 = vpop.f32.mrb[8].mxu1 }
 0x135   :  { %v402_v62 = vpop.f32.mrb[9].mxu1 }
 0x138   :  { %v2274_v4 = vpop.f32.mrb[10].mxu1 }
 0x139   :  { %v3711_v5 = vadd.f32 %v2274_v4, %v3708_v2  ;;  %v412_v6 = vpop.f32.mrb[11].mxu1 }
 0x13a   :  { %v3714_v7 = vadd.f32 %v412_v6, %v3708_v2 }
 0x13c   :  { %v2277_v9 = vpop.f32.mrb[12].mxu1 }
 0x13d   :  { %v3717_v12 = vadd.f32 %v2277_v9, %v3708_v2  ;;  %v422_v13 = vpop.f32.mrb[13].mxu1  ;;  %v3746_v9 = vrot.slane %v109_v1, %v113_v44 }
 0x13e   :  { %v3720_v17 = vadd.f32 %v422_v13, %v3708_v2 }
 0x140   :  { %v2280_v18 = vpop.f32.mrb[14].mxu1 }
 0x141   :  { %v3723_v20 = vadd.f32 %v2280_v18, %v3708_v2  ;;  %v432_v23 = vpop.f32.mrb[15].mxu1 }
 0x142   :  { %v3726_v24 = vadd.f32 %v432_v23, %v3708_v2 }
 0x144   :  { %v2283_v28 = vpop.f32.mrb[16].mxu1 }
 0x145   :  { %v3729_v29 = vadd.f32 %v2283_v28, %v3708_v2  ;;  %v442_v30 = vpop.f32.mrb[17].mxu1 }
 0x146   :  { %v3732_v33 = vadd.f32 %v442_v30, %v3708_v2 }
 0x148   :  { %v2286_v35 = vpop.f32.mrb[18].mxu1 }
 0x149   :  { %v3735_v37 = vadd.f32 %v2286_v35, %v3708_v2  ;;  %v452_v39 = vpop.f32.mrb[19].mxu1 }
 0x14a   :  { %v3738_v41 = vadd.f32 %v452_v39, %v3708_v2 }
 0x14c   :  { %v2289_v42 = vpop.f32.mrb[20].mxu1 }
 0x14d   :  { %v3741_v52 = vadd.f32 %v2289_v42, %v3708_v2  ;;  %v462_v59 = vpop.f32.mrb[21].mxu1 }
 0x14e   :  { %v3744_v4 = vadd.f32 %v462_v59, %v3708_v2 }
 0x14f   :  { %4145 = vst [vmem:[#allocation21_spill] sm:$0xff] %v3741_v52 }
 0x150   :  { %4146 = vst [vmem:[#allocation22_spill] sm:$0xff] %v3744_v4  ;;  %v2292_v6 = vpop.f32.mrb[22].mxu1 }
 0x151   :  { %v3749_v13 = vadd.f32 %v2292_v6, %v3708_v2  ;;  %v472_v18 = vpop.f32.mrb[23].mxu1  ;;  %v3756_v6 = vrot.slane %v109_v1, %v117_v58 }
 0x152   :  { %v3752_v28 = vadd.f32 %v472_v18, %v3708_v2  ;;  %v3762_v18 = vld [vmem:[%s4136_s5] ss:$0 sm:$0xff] }
 0x153   :  { %4147 = vst [vmem:[#allocation23_spill] sm:$0xff] %v3749_v13 }
 0x154   :  { %v598_v23 = vpop.f32.mrb[0].mxu0  ;;  %4148 = vst [vmem:[#allocation24_spill] sm:$0xff] %v3752_v28 }
 0x155   :  { %v3095_v30 = vadd.f32 %v598_v23, %v3746_v9  ;;  %v600_v35 = vpop.f32.mrb[1].mxu0 }
 0x156   :  { %v2327_v39 = vpop.f32.mrb[24].mxu1  ;;  %v3096_v13 = vadd.f32 %v600_v35, %v3756_v6 }
 0x157   :  { %v694_v42 = vmul.f32 0.5, %v3095_v30  ;;  %v675_v0 = vpop.f32.mrb[25].mxu1  ;;  %v691_v51 = vadd.f32 %v2327_v39, %v3762_v18 }
 0x158   :  { %v604_v59 = vpop.f32.mrb[2].mxu0  ;;  %v704_v23 = vmul.f32 0.5, %v3096_v13 }
 0x159   :  { %3169 = vtanh.f32 %v694_v42  ;;  %v3097_v44 = vadd.f32 %v604_v59, %v3746_v9  ;;  %v606_v55 = vpop.f32.mrb[3].mxu0  ;;  %v690_v42 = vadd.f32 %v3762_v18, %v675_v0 }
 0x15a   :  { %v3098_v30 = vadd.f32 %v606_v55, %v3756_v6  ;;  %v408_v55 = vadd.f32 %v3703_v60, %v3708_v2  ;;  %v4149_v60 = vmov 0.0  }
 0x15b   :  { %v695_v54 = vmul.f32 0.5, %v3097_v44 }
 0x15c   :  { %v705_v59 = vmul.f32 0.5, %v3098_v30 }
 0x15d   :  { %3171 = vtanh.f32 %v695_v54  ;;  %v403_v54 = vadd.f32 %v402_v62, %v3708_v2 }
 0x15e   :  { %3173 = vtanh.f32 %v704_v23 }
 0x15f   :  { %3175 = vtanh.f32 %v705_v59 }
 0x163   :  { %v3170_v57 = vpop.eup %3169 }
 0x164   :  { %v698_v28 = vadd.f32 1.0, %v3170_v57 }
 0x166   :  { %v700_v44 = vmul.f32 0.5, %v698_v28 }
 0x167   :  { %v3172_v58 = vpop.eup %3171 }
 0x168   :  { %v699_v1 = vadd.f32 1.0, %v3172_v58  ;;  %v712_v35 = vmul.f32 %v700_v44, %v690_v42  ;;  %v3174_v0 = vpop.eup %3173 }
 0x169   :  { %v708_v23 = vadd.f32 1.0, %v3174_v0  ;;  %v3176_v28 = vpop.eup %3175 }
 0x16a   :  { %v701_v52 = vmul.f32 0.5, %v699_v1  ;;  %v714_v4 = vadd.f32 %v712_v35, %v403_v54  ;;  %v709_v62 = vadd.f32 1.0, %v3176_v28 }
 0x16b   :  { %v710_v50 = vmul.f32 0.5, %v708_v23 }
 0x16c   :  { %v713_v13 = vmul.f32 %v701_v52, %v691_v51  ;;  %3177 = vtanh.f32 %v714_v4  ;;  %v711_v39 = vmul.f32 0.5, %v709_v62 }
 0x16e   :  { %v715_v57 = vadd.f32 %v713_v13, %v408_v55 }
 0x170   :  { %3179 = vtanh.f32 %v715_v57 }
 0x176   :  { %v3178_v30 = vpop.eup %3177 }
 0x177   :  { %v718_v42 = vsub.f32 %v3641_v21, %v3178_v30 }
 0x179   :  { %v720_v59 = vmul.f32 %v718_v42, %v710_v50 }
 0x17a   :  { %v3180_v44 = vpop.eup %3179 }
 0x17b   :  { %v3771_v58 = vadd.f32 %v3178_v30, %v720_v59  ;;  %v719_v54 = vsub.f32 %v3650_v32, %v3180_v44 }
 0x17d   :  { %724 = vst [vmem:[#allocation11] sm:$0xff] %v3771_v58  ;;  %791 = vmatmul.mubr.f32.vlgmr.msra.gmra.mrb[4].mxu0 %v3771_v58  ;;  %2360 = vmatprep.mubr.f32.mxu1 %v3771_v58  ;;  %v721_v51 = vmul.f32 %v719_v54, %v711_v39 }
 0x17e   :  { %796 = vmatprep.mubr.f32.mxu0 %v4149_v60  ;;  %2712 = vmatpush1.bf16.msra.mxu0 %v3496_v15 }
 0x17f   :  { %v3779_v2 = vadd.f32 %v3180_v44, %v721_v51  ;;  %2714 = vmatprep.subr.bf16.mxu0 %v3499_v16 }
 0x181   :  { %725 = vst [vmem:[#allocation11 + $0x8] sm:$0xff] %v3779_v2  ;;  %797 = vmatmul.mubr.f32.gmra.mrb[6].mxu0 %v3779_v2  ;;  %2361 = vmatmul.mubr.f32.vlgmr.msra.gmra.mrb[26].mxu1 %v3779_v2 }
 0x182   :  { %2716 = vmatpush1.bf16.msra.mxu0 %v3509_v25  ;;  %2744 = vmatpush3.bf16.msra.mxu1 %v3534_v43 }
 0x183   :  { %2718 = vmatprep.subr.bf16.mxu0 %v3512_v27  ;;  %2746 = vmatprep.subr.bf16.mxu1 %v3562_v61 }
 0x184   :  { %979 = vmatprep.mubr.f32.mxu0 %v4149_v60 }
 0x186   :  { %2720 = vmatpush1.bf16.msra.mxu0 %v3523_v34  ;;  %2748 = vmatpush3.bf16.msra.mxu1 %v3562_v61 }
 0x187   :  { %2722 = vmatprep.subr.bf16.mxu0 %v3526_v36  ;;  %2750 = vmatprep.subr.bf16.mxu1 %v3577_v8 }
 0x18a   :  { %2724 = vmatpush1.bf16.msra.mxu0 %v3538_v45  ;;  %2752 = vmatpush3.bf16.msra.mxu1 %v3577_v8 }
 0x18b   :  { %2726 = vmatprep.subr.bf16.mxu0 %v3543_v46  ;;  %2754 = vmatprep.subr.bf16.mxu1 %v3591_v19 }
 0x18e   :  { %2728 = vmatpush1.bf16.msra.mxu0 %v3552_v53  ;;  %2756 = vmatpush3.bf16.msra.mxu1 %v3591_v19 }
 0x18f   :  { %2730 = vmatprep.subr.bf16.mxu0 %v3557_v56  ;;  %2758 = vmatprep.subr.bf16.mxu1 %v3603_v26 }
 0x192   :  { %2732 = vmatpush1.bf16.msra.mxu0 %v3566_v63  ;;  %2760 = vmatpush3.bf16.msra.mxu1 %v3603_v26 }
 0x193   :  { %2734 = vmatprep.subr.bf16.mxu0 %v3571_v3  ;;  %2762 = vmatprep.subr.bf16.mxu1 %v3613_v31 }
 0x196   :  { %2736 = vmatpush1.bf16.msra.mxu0 %v3581_v10  ;;  %2764 = vmatpush3.bf16.msra.mxu1 %v3613_v31 }
 0x197   :  { %2738 = vmatprep.subr.bf16.mxu0 %v3585_v14  ;;  %2766 = vmatprep.subr.bf16.mxu1 %v3621_v40 }
 0x19a   :  { %2740 = vmatpush1.bf16.msra.mxu0 %v3595_v22  ;;  %2768 = vmatpush3.bf16.msra.mxu1 %v3621_v40 }
 0x19b   :  { %2770 = vmatprep.subr.bf16.mxu1 %v3630_v47  ;;  %2774 = vmatprep.subr.bf16.mxu0 %v3492_v11 }
 0x19e   :  { %2772 = vmatpush3.bf16.msra.mxu1 %v3630_v47 }
 0x19f   :  { %2806 = vmatprep.subr.bf16.mxu1 %v3534_v43 }
 0x250   :  { %v792_v21 = vpop.f32.mrb[4].mxu0 }
 0x251   :  { %v3099_v32 = vadd.f32 %v792_v21, %v3746_v9  ;;  %v794_v50 = vpop.f32.mrb[5].mxu0 }
 0x252   :  { %v3100_v0 = vadd.f32 %v794_v50, %v3756_v6 }
 0x253   :  { %v882_v52 = vmul.f32 0.5, %v3099_v32 }
 0x254   :  { %v798_v4 = vpop.f32.mrb[6].mxu0  ;;  %v2362_v1 = vpop.f32.mrb[26].mxu1  ;;  %v892_v23 = vmul.f32 0.5, %v3100_v0 }
 0x255   :  { %3181 = vtanh.f32 %v882_v52  ;;  %v3101_v35 = vadd.f32 %v798_v4, %v3746_v9  ;;  %v800_v55 = vpop.f32.mrb[7].mxu0  ;;  %v869_v13 = vpop.f32.mrb[27].mxu1  ;;  %v879_v21 = vadd.f32 %v2362_v1, %v3762_v18 }
 0x256   :  { %v3102_v28 = vadd.f32 %v800_v55, %v3756_v6  ;;  %v878_v59 = vadd.f32 %v3762_v18, %v869_v13 }
 0x257   :  { %v883_v57 = vmul.f32 0.5, %v3101_v35 }
 0x258   :  { %v893_v42 = vmul.f32 0.5, %v3102_v28 }
 0x259   :  { %3183 = vtanh.f32 %v883_v57 }
 0x25a   :  { %3185 = vtanh.f32 %v892_v23 }
 0x25b   :  { %3187 = vtanh.f32 %v893_v42 }
 0x25f   :  { %v3182_v30 = vpop.eup %3181 }
 0x260   :  { %v886_v62 = vadd.f32 1.0, %v3182_v30 }
 0x262   :  { %v888_v44 = vmul.f32 0.5, %v886_v62 }
 0x263   :  { %v3184_v39 = vpop.eup %3183 }
 0x264   :  { %v887_v54 = vadd.f32 1.0, %v3184_v39  ;;  %v900_v51 = vmul.f32 %v888_v44, %v878_v59  ;;  %v3186_v35 = vpop.eup %3185 }
 0x265   :  { %v896_v55 = vadd.f32 1.0, %v3186_v35  ;;  %v3188_v57 = vpop.eup %3187 }
 0x266   :  { %v889_v32 = vmul.f32 0.5, %v887_v54  ;;  %v902_v52 = vadd.f32 %v900_v51, %v3714_v7  ;;  %v897_v23 = vadd.f32 1.0, %v3188_v57 }
 0x267   :  { %v898_v13 = vmul.f32 0.5, %v896_v55 }
 0x268   :  { %v901_v50 = vmul.f32 %v889_v32, %v879_v21  ;;  %3189 = vtanh.f32 %v902_v52  ;;  %v899_v1 = vmul.f32 0.5, %v897_v23 }
 0x26a   :  { %v903_v4 = vadd.f32 %v901_v50, %v3711_v5 }
 0x26c   :  { %3191 = vtanh.f32 %v903_v4 }
 0x272   :  { %v3190_v0 = vpop.eup %3189 }
 0x273   :  { %v906_v28 = vsub.f32 %v3771_v58, %v3190_v0 }
 0x275   :  { %v908_v30 = vmul.f32 %v906_v28, %v898_v13 }
 0x276   :  { %v3192_v62 = vpop.eup %3191 }
 0x277   :  { %v907_v42 = vsub.f32 %v3779_v2, %v3192_v62  ;;  %v3826_v59 = vadd.f32 %v3190_v0, %v908_v30 }
 0x279   :  { %v909_v7 = vmul.f32 %v907_v42, %v899_v1  ;;  %913 = vst [vmem:[#allocation11 + $0x10] sm:$0xff] %v3826_v59  ;;  %980 = vmatmul.mubr.f32.vlgmr.msra.gmra.mrb[8].mxu0 %v3826_v59  ;;  %2395 = vmatprep.mubr.f32.mxu1 %v3826_v59 }
 0x27a   :  { %985 = vmatprep.mubr.f32.mxu0 %v4149_v60  ;;  %2776 = vmatpush1.bf16.msra.mxu0 %v3496_v15 }
 0x27b   :  { %v3833_v5 = vadd.f32 %v3192_v62, %v909_v7  ;;  %2778 = vmatprep.subr.bf16.mxu0 %v3499_v16 }
 0x27d   :  { %914 = vst [vmem:[#allocation11 + $0x18] sm:$0xff] %v3833_v5  ;;  %986 = vmatmul.mubr.f32.gmra.mrb[10].mxu0 %v3833_v5  ;;  %2396 = vmatmul.mubr.f32.vlgmr.msra.gmra.mrb[28].mxu1 %v3833_v5 }
 0x27e   :  { %2780 = vmatpush1.bf16.msra.mxu0 %v3509_v25  ;;  %2808 = vmatpush3.bf16.msra.mxu1 %v3534_v43 }
 0x27f   :  { %2782 = vmatprep.subr.bf16.mxu0 %v3512_v27  ;;  %2810 = vmatprep.subr.bf16.mxu1 %v3562_v61 }
 0x280   :  { %1168 = vmatprep.mubr.f32.mxu0 %v4149_v60 }
 0x282   :  { %2784 = vmatpush1.bf16.msra.mxu0 %v3523_v34  ;;  %2812 = vmatpush3.bf16.msra.mxu1 %v3562_v61 }
 0x283   :  { %2786 = vmatprep.subr.bf16.mxu0 %v3526_v36  ;;  %2814 = vmatprep.subr.bf16.mxu1 %v3577_v8 }
 0x286   :  { %2788 = vmatpush1.bf16.msra.mxu0 %v3538_v45  ;;  %2816 = vmatpush3.bf16.msra.mxu1 %v3577_v8 }
 0x287   :  { %2790 = vmatprep.subr.bf16.mxu0 %v3543_v46  ;;  %2818 = vmatprep.subr.bf16.mxu1 %v3591_v19 }
 0x28a   :  { %2792 = vmatpush1.bf16.msra.mxu0 %v3552_v53  ;;  %2820 = vmatpush3.bf16.msra.mxu1 %v3591_v19 }
 0x28b   :  { %2794 = vmatprep.subr.bf16.mxu0 %v3557_v56  ;;  %2822 = vmatprep.subr.bf16.mxu1 %v3603_v26 }
 0x28e   :  { %2796 = vmatpush1.bf16.msra.mxu0 %v3566_v63  ;;  %2824 = vmatpush3.bf16.msra.mxu1 %v3603_v26 }
 0x28f   :  { %2798 = vmatprep.subr.bf16.mxu0 %v3571_v3  ;;  %2826 = vmatprep.subr.bf16.mxu1 %v3613_v31 }
 0x292   :  { %2800 = vmatpush1.bf16.msra.mxu0 %v3581_v10  ;;  %2828 = vmatpush3.bf16.msra.mxu1 %v3613_v31 }
 0x293   :  { %2802 = vmatprep.subr.bf16.mxu0 %v3585_v14  ;;  %2830 = vmatprep.subr.bf16.mxu1 %v3621_v40 }
 0x296   :  { %2804 = vmatpush1.bf16.msra.mxu0 %v3595_v22  ;;  %2832 = vmatpush3.bf16.msra.mxu1 %v3621_v40 }
 0x297   :  { %2834 = vmatprep.subr.bf16.mxu1 %v3630_v47  ;;  %2838 = vmatprep.subr.bf16.mxu0 %v3492_v11 }
 0x29a   :  { %2836 = vmatpush3.bf16.msra.mxu1 %v3630_v47 }
 0x29b   :  { %2870 = vmatprep.subr.bf16.mxu1 %v3534_v43 }
 0x34c   :  { %v981_v58 = vpop.f32.mrb[8].mxu0 }
 0x34d   :  { %v3103_v2 = vadd.f32 %v981_v58, %v3746_v9  ;;  %v983_v44 = vpop.f32.mrb[9].mxu0 }
 0x34e   :  { %v3104_v4 = vadd.f32 %v983_v44, %v3756_v6 }
 0x34f   :  { %v1071_v39 = vmul.f32 0.5, %v3103_v2 }
 0x350   :  { %v987_v54 = vpop.f32.mrb[10].mxu0  ;;  %v2397_v51 = vpop.f32.mrb[28].mxu1  ;;  %v1081_v35 = vmul.f32 0.5, %v3104_v4 }
 0x351   :  { %3193 = vtanh.f32 %v1071_v39  ;;  %v3105_v21 = vadd.f32 %v987_v54, %v3746_v9  ;;  %v989_v32 = vpop.f32.mrb[11].mxu0  ;;  %v1058_v52 = vpop.f32.mrb[29].mxu1  ;;  %v1068_v42 = vadd.f32 %v2397_v51, %v3762_v18 }
 0x352   :  { %v3106_v55 = vadd.f32 %v989_v32, %v3756_v6  ;;  %v1067_v23 = vadd.f32 %v3762_v18, %v1058_v52 }
 0x353   :  { %v1072_v50 = vmul.f32 0.5, %v3105_v21 }
 0x354   :  { %v1082_v13 = vmul.f32 0.5, %v3106_v55 }
 0x355   :  { %3195 = vtanh.f32 %v1072_v50 }
 0x356   :  { %3197 = vtanh.f32 %v1081_v35 }
 0x357   :  { %3199 = vtanh.f32 %v1082_v13 }
 0x35b   :  { %v3194_v57 = vpop.eup %3193 }
 0x35c   :  { %v1075_v0 = vadd.f32 1.0, %v3194_v57 }
 0x35e   :  { %v1077_v28 = vmul.f32 0.5, %v1075_v0 }
 0x35f   :  { %v3196_v30 = vpop.eup %3195 }
 0x360   :  { %v1076_v62 = vadd.f32 1.0, %v3196_v30  ;;  %v1089_v1 = vmul.f32 %v1077_v28, %v1067_v23  ;;  %v3198_v39 = vpop.eup %3197 }
 0x361   :  { %v1085_v54 = vadd.f32 1.0, %v3198_v39  ;;  %v3200_v21 = vpop.eup %3199 }
 0x362   :  { %v1078_v7 = vmul.f32 0.5, %v1076_v62  ;;  %v1091_v58 = vadd.f32 %v1089_v1, %v3720_v17  ;;  %v1086_v50 = vadd.f32 1.0, %v3200_v21 }
 0x363   :  { %v1087_v52 = vmul.f32 0.5, %v1085_v54 }
 0x364   :  { %v1090_v2 = vmul.f32 %v1078_v7, %v1068_v42  ;;  %3201 = vtanh.f32 %v1091_v58  ;;  %v1088_v51 = vmul.f32 0.5, %v1086_v50 }
 0x366   :  { %v1092_v44 = vadd.f32 %v1090_v2, %v3717_v12 }
 0x368   :  { %3203 = vtanh.f32 %v1092_v44 }
 0x36e   :  { %v3202_v32 = vpop.eup %3201 }
 0x36f   :  { %v1095_v4 = vsub.f32 %v3826_v59, %v3202_v32 }
 0x371   :  { %v1097_v35 = vmul.f32 %v1095_v4, %v1087_v52 }
 0x372   :  { %v3204_v55 = vpop.eup %3203 }
 0x373   :  { %v1096_v57 = vsub.f32 %v3833_v5, %v3204_v55  ;;  %v3880_v0 = vadd.f32 %v3202_v32, %v1097_v35 }
 0x375   :  { %v1098_v17 = vmul.f32 %v1096_v57, %v1088_v51  ;;  %1102 = vst [vmem:[#allocation11 + $0x20] sm:$0xff] %v3880_v0  ;;  %1169 = vmatmul.mubr.f32.vlgmr.msra.gmra.mrb[12].mxu0 %v3880_v0  ;;  %2430 = vmatprep.mubr.f32.mxu1 %v3880_v0 }
 0x376   :  { %1174 = vmatprep.mubr.f32.mxu0 %v4149_v60  ;;  %2840 = vmatpush1.bf16.msra.mxu0 %v3496_v15 }
 0x377   :  { %v3887_v12 = vadd.f32 %v3204_v55, %v1098_v17  ;;  %2842 = vmatprep.subr.bf16.mxu0 %v3499_v16 }
 0x379   :  { %1103 = vst [vmem:[#allocation11 + $0x28] sm:$0xff] %v3887_v12  ;;  %1175 = vmatmul.mubr.f32.gmra.mrb[14].mxu0 %v3887_v12  ;;  %2431 = vmatmul.mubr.f32.vlgmr.msra.gmra.mrb[30].mxu1 %v3887_v12 }
 0x37a   :  { %2844 = vmatpush1.bf16.msra.mxu0 %v3509_v25  ;;  %2872 = vmatpush3.bf16.msra.mxu1 %v3534_v43 }
 0x37b   :  { %2846 = vmatprep.subr.bf16.mxu0 %v3512_v27  ;;  %2874 = vmatprep.subr.bf16.mxu1 %v3562_v61 }
 0x37c   :  { %1357 = vmatprep.mubr.f32.mxu0 %v4149_v60 }
 0x37e   :  { %2848 = vmatpush1.bf16.msra.mxu0 %v3523_v34  ;;  %2876 = vmatpush3.bf16.msra.mxu1 %v3562_v61 }
 0x37f   :  { %2850 = vmatprep.subr.bf16.mxu0 %v3526_v36  ;;  %2878 = vmatprep.subr.bf16.mxu1 %v3577_v8 }
 0x382   :  { %2852 = vmatpush1.bf16.msra.mxu0 %v3538_v45  ;;  %2880 = vmatpush3.bf16.msra.mxu1 %v3577_v8 }
 0x383   :  { %2854 = vmatprep.subr.bf16.mxu0 %v3543_v46  ;;  %2882 = vmatprep.subr.bf16.mxu1 %v3591_v19 }
 0x386   :  { %2856 = vmatpush1.bf16.msra.mxu0 %v3552_v53  ;;  %2884 = vmatpush3.bf16.msra.mxu1 %v3591_v19 }
 0x387   :  { %2858 = vmatprep.subr.bf16.mxu0 %v3557_v56  ;;  %2886 = vmatprep.subr.bf16.mxu1 %v3603_v26 }
 0x38a   :  { %2860 = vmatpush1.bf16.msra.mxu0 %v3566_v63  ;;  %2888 = vmatpush3.bf16.msra.mxu1 %v3603_v26 }
 0x38b   :  { %2862 = vmatprep.subr.bf16.mxu0 %v3571_v3  ;;  %2890 = vmatprep.subr.bf16.mxu1 %v3613_v31 }
 0x38e   :  { %2864 = vmatpush1.bf16.msra.mxu0 %v3581_v10  ;;  %2892 = vmatpush3.bf16.msra.mxu1 %v3613_v31 }
 0x38f   :  { %2866 = vmatprep.subr.bf16.mxu0 %v3585_v14  ;;  %2894 = vmatprep.subr.bf16.mxu1 %v3621_v40 }
 0x392   :  { %2868 = vmatpush1.bf16.msra.mxu0 %v3595_v22  ;;  %2896 = vmatpush3.bf16.msra.mxu1 %v3621_v40 }
 0x393   :  { %2898 = vmatprep.subr.bf16.mxu1 %v3630_v47  ;;  %2902 = vmatprep.subr.bf16.mxu0 %v3492_v11 }
 0x396   :  { %2900 = vmatpush3.bf16.msra.mxu1 %v3630_v47 }
 0x397   :  { %2934 = vmatprep.subr.bf16.mxu1 %v3534_v43 }
 0x448   :  { %v1170_v59 = vpop.f32.mrb[12].mxu0 }
 0x449   :  { %v3107_v5 = vadd.f32 %v1170_v59, %v3746_v9  ;;  %v1172_v13 = vpop.f32.mrb[13].mxu0 }
 0x44a   :  { %v3108_v58 = vadd.f32 %v1172_v13, %v3756_v6 }
 0x44b   :  { %v1260_v23 = vmul.f32 0.5, %v3107_v5 }
 0x44c   :  { %v1176_v28 = vpop.f32.mrb[14].mxu0  ;;  %v2432_v30 = vpop.f32.mrb[30].mxu1  ;;  %v1270_v2 = vmul.f32 0.5, %v3108_v58 }
 0x44d   :  { %3205 = vtanh.f32 %v1260_v23  ;;  %v3109_v62 = vadd.f32 %v1176_v28, %v3746_v9  ;;  %v1178_v1 = vpop.f32.mrb[15].mxu0  ;;  %v1247_v42 = vpop.f32.mrb[31].mxu1  ;;  %v1257_v55 = vadd.f32 %v2432_v30, %v3762_v18 }
 0x44e   :  { %v3110_v44 = vadd.f32 %v1178_v1, %v3756_v6  ;;  %v1256_v32 = vadd.f32 %v3762_v18, %v1247_v42 }
 0x44f   :  { %v1261_v7 = vmul.f32 0.5, %v3109_v62 }
 0x450   :  { %v1271_v21 = vmul.f32 0.5, %v3110_v44 }
 0x451   :  { %3207 = vtanh.f32 %v1261_v7 }
 0x452   :  { %3209 = vtanh.f32 %v1270_v2 }
 0x453   :  { %3211 = vtanh.f32 %v1271_v21 }
 0x457   :  { %v3206_v39 = vpop.eup %3205 }
 0x458   :  { %v1264_v54 = vadd.f32 1.0, %v3206_v39 }
 0x45a   :  { %v1266_v52 = vmul.f32 0.5, %v1264_v54 }
 0x45b   :  { %v3208_v50 = vpop.eup %3207 }
 0x45c   :  { %v1265_v4 = vadd.f32 1.0, %v3208_v50  ;;  %v1278_v35 = vmul.f32 %v1266_v52, %v1256_v32  ;;  %v3210_v5 = vpop.eup %3209 }
 0x45d   :  { %v1274_v13 = vadd.f32 1.0, %v3210_v5  ;;  %v3212_v23 = vpop.eup %3211 }
 0x45e   :  { %v1267_v51 = vmul.f32 0.5, %v1265_v4  ;;  %v1280_v57 = vadd.f32 %v1278_v35, %v3726_v24  ;;  %v1275_v1 = vadd.f32 1.0, %v3212_v23 }
 0x45f   :  { %v1276_v62 = vmul.f32 0.5, %v1274_v13 }
 0x460   :  { %v1279_v17 = vmul.f32 %v1267_v51, %v1257_v55  ;;  %3213 = vtanh.f32 %v1280_v57  ;;  %v1277_v30 = vmul.f32 0.5, %v1275_v1 }
 0x462   :  { %v1281_v59 = vadd.f32 %v1279_v17, %v3723_v20 }
 0x464   :  { %3215 = vtanh.f32 %v1281_v59 }
 0x46a   :  { %v3214_v28 = vpop.eup %3213 }
 0x46b   :  { %v1284_v42 = vsub.f32 %v3880_v0, %v3214_v28 }
 0x46d   :  { %v1286_v7 = vmul.f32 %v1284_v42, %v1276_v62 }
 0x46e   :  { %v3216_v58 = vpop.eup %3215 }
 0x46f   :  { %v1285_v2 = vsub.f32 %v3887_v12, %v3216_v58  ;;  %v3934_v44 = vadd.f32 %v3214_v28, %v1286_v7 }
 0x471   :  { %v1287_v24 = vmul.f32 %v1285_v2, %v1277_v30  ;;  %1291 = vst [vmem:[#allocation11 + $0x30] sm:$0xff] %v3934_v44  ;;  %1358 = vmatmul.mubr.f32.vlgmr.msra.gmra.mrb[16].mxu0 %v3934_v44  ;;  %2465 = vmatprep.mubr.f32.mxu1 %v3934_v44 }
 0x472   :  { %1363 = vmatprep.mubr.f32.mxu0 %v4149_v60  ;;  %2904 = vmatpush1.bf16.msra.mxu0 %v3496_v15 }
 0x473   :  { %v3941_v20 = vadd.f32 %v3216_v58, %v1287_v24  ;;  %2906 = vmatprep.subr.bf16.mxu0 %v3499_v16 }
 0x475   :  { %1292 = vst [vmem:[#allocation11 + $0x38] sm:$0xff] %v3941_v20  ;;  %1364 = vmatmul.mubr.f32.gmra.mrb[18].mxu0 %v3941_v20  ;;  %2466 = vmatmul.mubr.f32.vlgmr.msra.gmra.mrb[32].mxu1 %v3941_v20 }
 0x476   :  { %2908 = vmatpush1.bf16.msra.mxu0 %v3509_v25  ;;  %2936 = vmatpush3.bf16.msra.mxu1 %v3534_v43 }
 0x477   :  { %2910 = vmatprep.subr.bf16.mxu0 %v3512_v27  ;;  %2938 = vmatprep.subr.bf16.mxu1 %v3562_v61 }
 0x478   :  { %1546 = vmatprep.mubr.f32.mxu0 %v4149_v60 }
 0x47a   :  { %2912 = vmatpush1.bf16.msra.mxu0 %v3523_v34  ;;  %2940 = vmatpush3.bf16.msra.mxu1 %v3562_v61 }
 0x47b   :  { %2914 = vmatprep.subr.bf16.mxu0 %v3526_v36  ;;  %2942 = vmatprep.subr.bf16.mxu1 %v3577_v8 }
 0x47e   :  { %2916 = vmatpush1.bf16.msra.mxu0 %v3538_v45  ;;  %2944 = vmatpush3.bf16.msra.mxu1 %v3577_v8 }
 0x47f   :  { %2918 = vmatprep.subr.bf16.mxu0 %v3543_v46  ;;  %2946 = vmatprep.subr.bf16.mxu1 %v3591_v19 }
 0x482   :  { %2920 = vmatpush1.bf16.msra.mxu0 %v3552_v53  ;;  %2948 = vmatpush3.bf16.msra.mxu1 %v3591_v19 }
 0x483   :  { %2922 = vmatprep.subr.bf16.mxu0 %v3557_v56  ;;  %2950 = vmatprep.subr.bf16.mxu1 %v3603_v26 }
 0x486   :  { %2924 = vmatpush1.bf16.msra.mxu0 %v3566_v63  ;;  %2952 = vmatpush3.bf16.msra.mxu1 %v3603_v26 }
 0x487   :  { %2926 = vmatprep.subr.bf16.mxu0 %v3571_v3  ;;  %2954 = vmatprep.subr.bf16.mxu1 %v3613_v31 }
 0x48a   :  { %2928 = vmatpush1.bf16.msra.mxu0 %v3581_v10  ;;  %2956 = vmatpush3.bf16.msra.mxu1 %v3613_v31 }
 0x48b   :  { %2930 = vmatprep.subr.bf16.mxu0 %v3585_v14  ;;  %2958 = vmatprep.subr.bf16.mxu1 %v3621_v40 }
 0x48e   :  { %2932 = vmatpush1.bf16.msra.mxu0 %v3595_v22  ;;  %2960 = vmatpush3.bf16.msra.mxu1 %v3621_v40 }
 0x48f   :  { %2962 = vmatprep.subr.bf16.mxu1 %v3630_v47  ;;  %2966 = vmatprep.subr.bf16.mxu0 %v3492_v11 }
 0x492   :  { %2964 = vmatpush3.bf16.msra.mxu1 %v3630_v47 }
 0x493   :  { %2998 = vmatprep.subr.bf16.mxu1 %v3534_v43 }
 0x544   :  { %v1359_v0 = vpop.f32.mrb[16].mxu0 }
 0x545   :  { %v3111_v12 = vadd.f32 %v1359_v0, %v3746_v9  ;;  %v1361_v39 = vpop.f32.mrb[17].mxu0 }
 0x546   :  { %v3112_v55 = vadd.f32 %v1361_v39, %v3756_v6 }
 0x547   :  { %v1449_v54 = vmul.f32 0.5, %v3111_v12 }
 0x548   :  { %v1365_v21 = vpop.f32.mrb[18].mxu0  ;;  %v2467_v32 = vpop.f32.mrb[32].mxu1  ;;  %v1459_v51 = vmul.f32 0.5, %v3112_v55 }
 0x549   :  { %3217 = vtanh.f32 %v1449_v54  ;;  %v3113_v52 = vadd.f32 %v1365_v21, %v3746_v9  ;;  %v1367_v50 = vpop.f32.mrb[19].mxu0  ;;  %v1436_v4 = vpop.f32.mrb[33].mxu1  ;;  %v1446_v42 = vadd.f32 %v2467_v32, %v3762_v18 }
 0x54a   :  { %v3114_v57 = vadd.f32 %v1367_v50, %v3756_v6  ;;  %v1445_v13 = vadd.f32 %v3762_v18, %v1436_v4 }
 0x54b   :  { %v1450_v35 = vmul.f32 0.5, %v3113_v52 }
 0x54c   :  { %v1460_v5 = vmul.f32 0.5, %v3114_v57 }
 0x54d   :  { %3219 = vtanh.f32 %v1450_v35 }
 0x54e   :  { %3221 = vtanh.f32 %v1459_v51 }
 0x54f   :  { %3223 = vtanh.f32 %v1460_v5 }
 0x553   :  { %v3218_v17 = vpop.eup %3217 }
 0x554   :  { %v1453_v59 = vadd.f32 1.0, %v3218_v17 }
 0x556   :  { %v1455_v23 = vmul.f32 0.5, %v1453_v59 }
 0x557   :  { %v3220_v28 = vpop.eup %3219 }
 0x558   :  { %v1454_v62 = vadd.f32 1.0, %v3220_v28  ;;  %v1467_v1 = vmul.f32 %v1455_v23, %v1445_v13  ;;  %v3222_v24 = vpop.eup %3221 }
 0x559   :  { %v1463_v0 = vadd.f32 1.0, %v3222_v24  ;;  %v3224_v12 = vpop.eup %3223 }
 0x55a   :  { %v1456_v7 = vmul.f32 0.5, %v1454_v62  ;;  %v1469_v58 = vadd.f32 %v1467_v1, %v3732_v33  ;;  %v1464_v21 = vadd.f32 1.0, %v3224_v12 }
 0x55b   :  { %v1465_v54 = vmul.f32 0.5, %v1463_v0 }
 0x55c   :  { %v1468_v30 = vmul.f32 %v1456_v7, %v1446_v42  ;;  %3225 = vtanh.f32 %v1469_v58  ;;  %v1466_v32 = vmul.f32 0.5, %v1464_v21 }
 0x55e   :  { %v1470_v2 = vadd.f32 %v1468_v30, %v3729_v29 }
 0x560   :  { %3227 = vtanh.f32 %v1470_v2 }
 0x566   :  { %v3226_v39 = vpop.eup %3225 }
 0x567   :  { %v1473_v52 = vsub.f32 %v3934_v44, %v3226_v39 }
 0x569   :  { %v1475_v50 = vmul.f32 %v1473_v52, %v1465_v54 }
 0x56a   :  { %v3228_v4 = vpop.eup %3227 }
 0x56b   :  { %v1474_v35 = vsub.f32 %v3941_v20, %v3228_v4  ;;  %v3988_v55 = vadd.f32 %v3226_v39, %v1475_v50 }
 0x56d   :  { %v1476_v33 = vmul.f32 %v1474_v35, %v1466_v32  ;;  %1480 = vst [vmem:[#allocation11 + $0x40] sm:$0xff] %v3988_v55  ;;  %1547 = vmatmul.mubr.f32.vlgmr.msra.gmra.mrb[20].mxu0 %v3988_v55  ;;  %2500 = vmatprep.mubr.f32.mxu1 %v3988_v55 }
 0x56e   :  { %1552 = vmatprep.mubr.f32.mxu0 %v4149_v60  ;;  %2968 = vmatpush1.bf16.msra.mxu0 %v3496_v15 }
 0x56f   :  { %v3995_v29 = vadd.f32 %v3228_v4, %v1476_v33  ;;  %2970 = vmatprep.subr.bf16.mxu0 %v3499_v16 }
 0x571   :  { %1481 = vst [vmem:[#allocation11 + $0x48] sm:$0xff] %v3995_v29  ;;  %1553 = vmatmul.mubr.f32.gmra.mrb[22].mxu0 %v3995_v29  ;;  %2501 = vmatmul.mubr.f32.vlgmr.msra.gmra.mrb[34].mxu1 %v3995_v29 }
 0x572   :  { %2972 = vmatpush1.bf16.msra.mxu0 %v3509_v25  ;;  %3000 = vmatpush3.bf16.msra.mxu1 %v3534_v43 }
 0x573   :  { %2974 = vmatprep.subr.bf16.mxu0 %v3512_v27  ;;  %3002 = vmatprep.subr.bf16.mxu1 %v3562_v61 }
 0x574   :  { %1735 = vmatprep.mubr.f32.mxu0 %v4149_v60 }
 0x576   :  { %2976 = vmatpush1.bf16.msra.mxu0 %v3523_v34  ;;  %3004 = vmatpush3.bf16.msra.mxu1 %v3562_v61 }
 0x577   :  { %2978 = vmatprep.subr.bf16.mxu0 %v3526_v36  ;;  %3006 = vmatprep.subr.bf16.mxu1 %v3577_v8 }
 0x57a   :  { %2980 = vmatpush1.bf16.msra.mxu0 %v3538_v45  ;;  %3008 = vmatpush3.bf16.msra.mxu1 %v3577_v8 }
 0x57b   :  { %2982 = vmatprep.subr.bf16.mxu0 %v3543_v46  ;;  %3010 = vmatprep.subr.bf16.mxu1 %v3591_v19 }
 0x57e   :  { %2984 = vmatpush1.bf16.msra.mxu0 %v3552_v53  ;;  %3012 = vmatpush3.bf16.msra.mxu1 %v3591_v19 }
 0x57f   :  { %2986 = vmatprep.subr.bf16.mxu0 %v3557_v56  ;;  %3014 = vmatprep.subr.bf16.mxu1 %v3603_v26 }
 0x582   :  { %2988 = vmatpush1.bf16.msra.mxu0 %v3566_v63  ;;  %3016 = vmatpush3.bf16.msra.mxu1 %v3603_v26 }
 0x583   :  { %2990 = vmatprep.subr.bf16.mxu0 %v3571_v3  ;;  %3018 = vmatprep.subr.bf16.mxu1 %v3613_v31 }
 0x586   :  { %2992 = vmatpush1.bf16.msra.mxu0 %v3581_v10  ;;  %3020 = vmatpush3.bf16.msra.mxu1 %v3613_v31 }
 0x587   :  { %2994 = vmatprep.subr.bf16.mxu0 %v3585_v14  ;;  %3022 = vmatprep.subr.bf16.mxu1 %v3621_v40 }
 0x58a   :  { %2996 = vmatpush1.bf16.msra.mxu0 %v3595_v22  ;;  %3024 = vmatpush3.bf16.msra.mxu1 %v3621_v40 }
 0x58b   :  { %3026 = vmatprep.subr.bf16.mxu1 %v3630_v47  ;;  %3030 = vmatprep.subr.bf16.mxu0 %v3492_v11 }
 0x58e   :  { %3028 = vmatpush3.bf16.msra.mxu1 %v3630_v47 }
 0x58f   :  { %3062 = vmatprep.subr.bf16.mxu1 %v3534_v43 }
 0x640   :  { %v1548_v44 = vpop.f32.mrb[20].mxu0 }
 0x641   :  { %v3115_v20 = vadd.f32 %v1548_v44, %v3746_v9  ;;  %v1550_v51 = vpop.f32.mrb[21].mxu0 }
 0x642   :  { %v3116_v11 = vadd.f32 %v1550_v51, %v3756_v6 }
 0x643   :  { %v1638_v57 = vmul.f32 0.5, %v3115_v20 }
 0x644   :  { %v1554_v17 = vpop.f32.mrb[22].mxu0  ;;  %v2502_v59 = vpop.f32.mrb[34].mxu1  ;;  %v1648_v62 = vmul.f32 0.5, %v3116_v11 }
 0x645   :  { %3229 = vtanh.f32 %v1638_v57  ;;  %v3117_v5 = vadd.f32 %v1554_v17, %v3746_v9  ;;  %v1556_v13 = vpop.f32.mrb[23].mxu0  ;;  %v1625_v23 = vpop.f32.mrb[35].mxu1  ;;  %v1635_v39 = vadd.f32 %v2502_v59, %v3762_v18 }
 0x646   :  { %v3118_v1 = vadd.f32 %v1556_v13, %v3756_v6  ;;  %v1634_v30 = vadd.f32 %v3762_v18, %v1625_v23  ;;  %v4151_v23 = vld [vmem:[#allocation22_spill] sm:$0xff] }
 0x647   :  { %v1639_v28 = vmul.f32 0.5, %v3117_v5 }
 0x648   :  { %v1649_v58 = vmul.f32 0.5, %v3118_v1 }
 0x649   :  { %3231 = vtanh.f32 %v1639_v28 }
 0x64a   :  { %3233 = vtanh.f32 %v1648_v62  ;;  %v4152_v62 = vld [vmem:[#allocation21_spill] sm:$0xff] }
 0x64b   :  { %3235 = vtanh.f32 %v1649_v58 }
 0x64f   :  { %v3230_v42 = vpop.eup %3229 }
 0x650   :  { %v1642_v7 = vadd.f32 1.0, %v3230_v42 }
 0x652   :  { %v1644_v2 = vmul.f32 0.5, %v1642_v7 }
 0x653   :  { %v3232_v24 = vpop.eup %3231 }
 0x654   :  { %v1643_v0 = vadd.f32 1.0, %v3232_v24  ;;  %v1656_v12 = vmul.f32 %v1644_v2, %v1634_v30  ;;  %v3234_v4 = vpop.eup %3233 }
 0x655   :  { %v1652_v32 = vadd.f32 1.0, %v3234_v4  ;;  %v3236_v35 = vpop.eup %3235 }
 0x656   :  { %v1645_v54 = vmul.f32 0.5, %v1643_v0  ;;  %v1658_v21 = vadd.f32 %v1656_v12, %v3738_v41  ;;  %v1653_v20 = vadd.f32 1.0, %v3236_v35 }
 0x657   :  { %v1654_v44 = vmul.f32 0.5, %v1652_v32  ;;  %v4153_v32 = vld [vmem:[#allocation17_spill] sm:$0xff] }
 0x658   :  { %v1657_v52 = vmul.f32 %v1645_v54, %v1635_v39  ;;  %3237 = vtanh.f32 %v1658_v21  ;;  %v1655_v18 = vmul.f32 0.5, %v1653_v20  ;;  %v326_v35 = vadd.f32 %v4153_v32, %v3746_v9 }
 0x65a   :  { %v1659_v50 = vadd.f32 %v1657_v52, %v3735_v37 }
 0x65c   :  { %3239 = vtanh.f32 %v1659_v50 }
 0x662   :  { %v3238_v33 = vpop.eup %3237 }
 0x663   :  { %v1662_v51 = vsub.f32 %v3988_v55, %v3238_v33 }
 0x665   :  { %v1664_v57 = vmul.f32 %v1662_v51, %v1654_v44 }
 0x666   :  { %v3240_v17 = vpop.eup %3239 }
 0x667   :  { %v1663_v59 = vsub.f32 %v3995_v29, %v3240_v17  ;;  %v4042_v5 = vadd.f32 %v3238_v33, %v1664_v57  ;;  %v4154_v33 = vld [vmem:[#allocation18_spill] sm:$0xff] }
 0x668   :  { %v328_v44 = vadd.f32 %v4154_v33, %v3756_v6 }
 0x669   :  { %v1665_v41 = vmul.f32 %v1663_v59, %v1655_v18  ;;  %1669 = vst [vmem:[#allocation11 + $0x50] sm:$0xff] %v4042_v5  ;;  %1736 = vmatmul.mubr.f32.vlgmr.msra.gmra.mrb[24].mxu0 %v4042_v5  ;;  %2535 = vmatprep.mubr.f32.mxu1 %v4042_v5  ;;  %v4155_v18 = vld [vmem:[#allocation19_spill] sm:$0xff] }
 0x66a   :  { %1741 = vmatprep.mubr.f32.mxu0 %v4149_v60  ;;  %3032 = vmatpush1.bf16.msra.mxu0 %v3496_v15  ;;  %v314_v15 = vadd.f32 %v3687_v38, %v3746_v9  ;;  %v332_v59 = vadd.f32 %v4155_v18, %v3746_v9 }
 0x66b   :  { %v4049_v37 = vadd.f32 %v3240_v17, %v1665_v41  ;;  %3034 = vmatprep.subr.bf16.mxu0 %v3499_v16  ;;  %v316_v16 = vadd.f32 %v3689_v48, %v3756_v6 }
 0x66d   :  { %1670 = vst [vmem:[#allocation11 + $0x58] sm:$0xff] %v4049_v37  ;;  %1742 = vmatmul.mubr.f32.gmra.mrb[26].mxu0 %v4049_v37  ;;  %2536 = vmatmul.mubr.f32.vlgmr.msra.gmra.mrb[36].mxu1 %v4049_v37 }
 0x66e   :  { %3036 = vmatpush1.bf16.msra.mxu0 %v3509_v25  ;;  %3064 = vmatpush3.bf16.msra.mxu1 %v3534_v43  ;;  %v320_v43 = vadd.f32 %v3691_v49, %v3746_v9 }
 0x66f   :  { %3038 = vmatprep.subr.bf16.mxu0 %v3512_v27  ;;  %3066 = vmatprep.subr.bf16.mxu1 %v3562_v61 }
 0x670   :  { %1924 = vmatprep.mubr.f32.mxu0 %v4149_v60 }
 0x672   :  { %3040 = vmatpush1.bf16.msra.mxu0 %v3523_v34  ;;  %3068 = vmatpush3.bf16.msra.mxu1 %v3562_v61 }
 0x673   :  { %3042 = vmatprep.subr.bf16.mxu0 %v3526_v36  ;;  %3070 = vmatprep.subr.bf16.mxu1 %v3577_v8 }
 0x676   :  { %3044 = vmatpush1.bf16.msra.mxu0 %v3538_v45  ;;  %3072 = vmatpush3.bf16.msra.mxu1 %v3577_v8 }
 0x677   :  { %3046 = vmatprep.subr.bf16.mxu0 %v3543_v46  ;;  %3074 = vmatprep.subr.bf16.mxu1 %v3591_v19  ;;  %v4150_v46 = vld [vmem:[#allocation16_spill] sm:$0xff] }
 0x67a   :  { %3048 = vmatpush1.bf16.msra.mxu0 %v3552_v53  ;;  %3076 = vmatpush3.bf16.msra.mxu1 %v3591_v19  ;;  %v322_v53 = vadd.f32 %v4150_v46, %v3756_v6 }
 0x67b   :  { %3050 = vmatprep.subr.bf16.mxu0 %v3557_v56  ;;  %3078 = vmatprep.subr.bf16.mxu1 %v3603_v26 }
 0x67e   :  { %3052 = vmatpush1.bf16.msra.mxu0 %v3566_v63  ;;  %3080 = vmatpush3.bf16.msra.mxu1 %v3603_v26 }
 0x67f   :  { %3054 = vmatprep.subr.bf16.mxu0 %v3571_v3  ;;  %3082 = vmatprep.subr.bf16.mxu1 %v3613_v31 }
 0x682   :  { %3056 = vmatpush1.bf16.msra.mxu0 %v3581_v10  ;;  %3084 = vmatpush3.bf16.msra.mxu1 %v3613_v31 }
 0x683   :  { %3058 = vmatprep.subr.bf16.mxu0 %v3585_v14  ;;  %3086 = vmatprep.subr.bf16.mxu1 %v3621_v40 }
 0x686   :  { %3060 = vmatpush1.bf16.msra.mxu0 %v3595_v22  ;;  %3088 = vmatpush3.bf16.msra.mxu1 %v3621_v40  ;;  %v4095_v40 = vld [vmem:[%s4136_s5] ss:$0 sm:$0xff]  ;;  %s3393_s5 = smov [#allocation11]  }
 0x687   :  { %3090 = vmatprep.subr.bf16.mxu1 %v3630_v47  ;;  %s2056_s28 = sshll.u32 %s3393_s5, 4  ;;  %s2057_s28 = int_to_ptr.vmem [resolvable:$true] %s2056_s28 }
 0x688   :  { %s3354_s29 = scalar_lea.vmem %s2057_s28, 2048  ;;  %p3359_p5 = scmp.lt.s32.totalorder %s2057_s28, %s2057_s28 }
 0x689   :  { %p3355_p4 = scmp.ne.s32.totalorder %s2057_s28, %s3354_s29  ;;  %p3360_p6 = scmp.lt.s32.totalorder %s3354_s29, %s3354_s29 }
 0x68a   :  { %3092 = vmatpush3.bf16.msra.mxu1 %v3630_v47 }
 0x68b   :  { %p3361_p7 = por %p3360_p6, %p3359_p5 }
 0x68d   :  { %p3362_p8 = pnand %p3361_p7, %p3355_p4 }
 0x73c   :  { %v1737_v25 = vpop.f32.mrb[24].mxu0 }
 0x73d   :  { %v1825_v27 = vadd.f32 %v1737_v25, %v314_v15  ;;  %v1739_v34 = vpop.f32.mrb[25].mxu0 }
 0x73e   :  { %v1835_v36 = vadd.f32 %v1739_v34, %v316_v16 }
 0x73f   :  { %v1827_v45 = vmul.f32 0.5, %v1825_v27 }
 0x740   :  { %v1743_v56 = vpop.f32.mrb[26].mxu0  ;;  %v2537_v61 = vpop.f32.mrb[36].mxu1  ;;  %v1837_v19 = vmul.f32 0.5, %v1835_v36 }
 0x741   :  { %3241 = vtanh.f32 %v1827_v45  ;;  %v1826_v63 = vadd.f32 %v1743_v56, %v320_v43  ;;  %v1745_v3 = vpop.f32.mrb[27].mxu0  ;;  %v1814_v8 = vpop.f32.mrb[37].mxu1  ;;  %v1824_v29 = vadd.f32 %v4095_v40, %v2537_v61 }
 0x742   :  { %v1836_v10 = vadd.f32 %v1745_v3, %v322_v53  ;;  %v1823_v47 = vadd.f32 %v4095_v40, %v1814_v8 }
 0x743   :  { %v1828_v14 = vmul.f32 0.5, %v1826_v63 }
 0x744   :  { %v1838_v31 = vmul.f32 0.5, %v1836_v10  ;;  %v4157_v10 = vld [vmem:[#allocation24_spill] sm:$0xff] }
 0x745   :  { %3243 = vtanh.f32 %v1828_v14 }
 0x746   :  { %3245 = vtanh.f32 %v1837_v19 }
 0x747   :  { %3247 = vtanh.f32 %v1838_v31 }
 0x74b   :  { %v3242_v22 = vpop.eup %3241 }
 0x74c   :  { %v1831_v26 = vadd.f32 1.0, %v3242_v22  ;;  %v4158_v22 = vld [vmem:[#allocation23_spill] sm:$0xff] }
 0x74e   :  { %v1833_v38 = vmul.f32 0.5, %v1831_v26 }
 0x74f   :  { %v3244_v48 = vpop.eup %3243 }
 0x750   :  { %v1832_v49 = vadd.f32 1.0, %v3244_v48  ;;  %v1845_v55 = vmul.f32 %v1833_v38, %v1823_v47  ;;  %v3246_v42 = vpop.eup %3245 }
 0x751   :  { %v1841_v7 = vadd.f32 1.0, %v3246_v42  ;;  %v3248_v58 = vpop.eup %3247 }
 0x752   :  { %v1834_v13 = vmul.f32 0.5, %v1832_v49  ;;  %v1847_v28 = vadd.f32 %v1845_v55, %v4151_v23  ;;  %v1842_v24 = vadd.f32 1.0, %v3248_v58 }
 0x753   :  { %v1843_v2 = vmul.f32 0.5, %v1841_v7 }
 0x754   :  { %v1846_v11 = vmul.f32 %v1834_v13, %v1824_v29  ;;  %3249 = vtanh.f32 %v1847_v28  ;;  %v1844_v54 = vmul.f32 0.5, %v1842_v24 }
 0x756   :  { %v1848_v1 = vadd.f32 %v1846_v11, %v4152_v62 }
 0x758   :  { %3251 = vtanh.f32 %v1848_v1 }
 0x75e   :  { %v3250_v30 = vpop.eup %3249 }
 0x75f   :  { %v1851_v0 = vsub.f32 %v4042_v5, %v3250_v30 }
 0x761   :  { %v1853_v12 = vmul.f32 %v1851_v0, %v1843_v2 }
 0x762   :  { %v3252_v39 = vpop.eup %3251 }
 0x763   :  { %v1852_v21 = vsub.f32 %v4049_v37, %v3252_v39  ;;  %v1855_v52 = vadd.f32 %v3250_v30, %v1853_v12 }
 0x765   :  { %v1854_v50 = vmul.f32 %v1852_v21, %v1844_v54  ;;  %1858 = vst [vmem:[#allocation11 + $0x60] sm:$0xff] %v1855_v52  ;;  %1925 = vmatmul.mubr.f32.vlgmr.msra.gmra.mrb[28].mxu0 %v1855_v52  ;;  %2570 = vmatprep.mubr.f32.mxu1 %v1855_v52 }
 0x766   :  { %1930 = vmatprep.mubr.f32.mxu0 %v4149_v60  ;;  %v4156_v60 = vld [vmem:[#allocation20_spill] sm:$0xff] }
 0x767   :  { %v1856_v4 = vadd.f32 %v3252_v39, %v1854_v50  ;;  %v334_v41 = vadd.f32 %v4156_v60, %v3756_v6 }
 0x769   :  { %1859 = vst [vmem:[#allocation11 + $0x68] sm:$0xff] %v1856_v4  ;;  %1931 = vmatmul.mubr.f32.gmra.mrb[30].mxu0 %v1856_v4  ;;  %2571 = vmatmul.mubr.f32.vlgmr.msra.gmra.mrb[38].mxu1 %v1856_v4 }
 0x838   :  { %v1926_v20 = vpop.f32.mrb[28].mxu0 }
 0x839   :  { %v2014_v51 = vadd.f32 %v1926_v20, %v326_v35  ;;  %v1928_v57 = vpop.f32.mrb[29].mxu0 }
 0x83a   :  { %v2024_v17 = vadd.f32 %v1928_v57, %v328_v44 }
 0x83b   :  { %v2016_v5 = vmul.f32 0.5, %v2014_v51 }
 0x83c   :  { %v1932_v37 = vpop.f32.mrb[30].mxu0  ;;  %v2572_v15 = vpop.f32.mrb[38].mxu1  ;;  %v2026_v43 = vmul.f32 0.5, %v2024_v17 }
 0x83d   :  { %3253 = vtanh.f32 %v2016_v5  ;;  %v2015_v16 = vadd.f32 %v1932_v37, %v332_v59  ;;  %v1934_v25 = vpop.f32.mrb[31].mxu0  ;;  %v2003_v27 = vpop.f32.mrb[39].mxu1  ;;  %v2013_v3 = vadd.f32 %v4095_v40, %v2572_v15 }
 0x83e   :  { %v2025_v34 = vadd.f32 %v1934_v25, %v334_v41  ;;  %v2012_v9 = vadd.f32 %v4095_v40, %v2003_v27 }
 0x83f   :  { %v2017_v36 = vmul.f32 0.5, %v2015_v16 }
 0x840   :  { %v2027_v53 = vmul.f32 0.5, %v2025_v34 }
 0x841   :  { %3255 = vtanh.f32 %v2017_v36 }
 0x842   :  { %3257 = vtanh.f32 %v2026_v43 }
 0x843   :  { %3259 = vtanh.f32 %v2027_v53 }
 0x847   :  { %v3254_v45 = vpop.eup %3253 }
 0x848   :  { %v2020_v46 = vadd.f32 1.0, %v3254_v45 }
 0x84a   :  { %v2022_v56 = vmul.f32 0.5, %v2020_v46 }
 0x84b   :  { %v3256_v61 = vpop.eup %3255 }
 0x84c   :  { %v2021_v63 = vadd.f32 1.0, %v3256_v61  ;;  %v2034_v6 = vmul.f32 %v2022_v56, %v2012_v9  ;;  %v3258_v31 = vpop.eup %3257 }
 0x84d   :  { %v2030_v47 = vadd.f32 1.0, %v3258_v31  ;;  %v3260_v38 = vpop.eup %3259 }
 0x84e   :  { %v2023_v8 = vmul.f32 0.5, %v2021_v63  ;;  %v2036_v14 = vadd.f32 %v2034_v6, %v4157_v10  ;;  %v2031_v55 = vadd.f32 1.0, %v3260_v38 }
 0x84f   :  { %v2032_v49 = vmul.f32 0.5, %v2030_v47 }
 0x850   :  { %v2035_v19 = vmul.f32 %v2023_v8, %v2013_v3  ;;  %3261 = vtanh.f32 %v2036_v14  ;;  %v2033_v28 = vmul.f32 0.5, %v2031_v55 }
 0x852   :  { %v2037_v26 = vadd.f32 %v2035_v19, %v4158_v22 }
 0x854   :  { %3263 = vtanh.f32 %v2037_v26 }
 0x85a   :  { %v3262_v48 = vpop.eup %3261 }
 0x85b   :  { %v2040_v29 = vsub.f32 %v1855_v52, %v3262_v48 }
 0x85d   :  { %v2042_v13 = vmul.f32 %v2040_v29, %v2032_v49 }
 0x85e   :  { %v3264_v23 = vpop.eup %3263 }
 0x85f   :  { %v2041_v40 = vsub.f32 %v1856_v4, %v3264_v23  ;;  %v2044_v11 = vadd.f32 %v3262_v48, %v2042_v13 }
 0x861   :  { %v2043_v62 = vmul.f32 %v2041_v40, %v2033_v28  ;;  %2047 = vst [vmem:[#allocation11 + $0x70] sm:$0xff] %v2044_v11 }
 0x863   :  { %v2045_v1 = vadd.f32 %v3264_v23, %v2043_v62 }
 0x865   :  { %2048 = vst [vmem:[#allocation11 + $0x78] sm:$0xff] %v2045_v1 }
 0x866   :  { %3365 = shalt.err (!%p3362_p8)
}
 0x867   :  { %s3366_s8 = scalar_lea.hbm %s4137_s6, 2048 }
 0x868   :  { %p3367_p9 = scmp.ne.s32.totalorder %s4137_s6, %s3366_s8  ;;  %p3370_p10 = scmp.lt.u32.totalorder %s3366_s8, %s4137_s6 }
 0x86a   :  { %p3372_p11 = pnand %p3370_p10, %p3367_p9 }
 0x86c   :  { %3375 = shalt.err (!%p3372_p11)
}
 0x86d   :  { %2062 = dma.vmem_to_hbm [thread:$0]  %s2057_s28, 2048, %s4137_s6, [#allocation5], %s3386_s9, %s3386_s9, %s3387_s10  }
 0x86e   :  { %3382 = dma.done.wait [#allocation5], 2048  }
 0x86f   :  { %3383 = vsyncadd [#allocation5], 4294965248 }
 0x870   :  { %2066 = vsyncpa [#allocation4], 1 }
 0x871   :  { %2067 = vsyncpa [#allocation7], 1 }
 0x872   :  { %2068 = vsyncpa [#allocation10], 1 }
 0x873   :  { %2069 = vsyncpa [#allocation5], 1 }

</bundles_post_ra>
